<compile_context>
chip_gen: v6e
topology: v6e:2x2x1
jax: 0.10.0
libtpu: 0.0.40
codegen_flags: <defaults>
</compile_context>

<pallas_src>
import functools
import math

import jax
import jax.numpy as jnp
from jax import lax
from jax.experimental import pallas as pl
from jax.experimental.pallas import tpu as pltpu


def _mha_kernel(num_heads, d_head, q_block,
                x_ref, wq_ref, bq_ref, wk_ref, bk_ref, wv_ref, bv_ref,
                wo_ref, bo_ref, o_ref, q_scr, k_scr, v_scr, acc_scr):
    """One (batch, query-tile) grid step of multi-head self-attention."""
    qi = pl.program_id(1)
    scale = 1.0 / math.sqrt(d_head)

    # ---- K/V projection: once per batch element, cached in VMEM scratch ----
    @pl.when(qi == 0)
    def _():
        x_bf = x_ref[0]                                                # (S, D) bf16
        k_full = jnp.dot(x_bf, wk_ref[...],
                         preferred_element_type=jnp.float32) + bk_ref[...]
        v_full = jnp.dot(x_bf, wv_ref[...],
                         preferred_element_type=jnp.float32) + bv_ref[...]
        k_bf = k_full.astype(jnp.bfloat16)
        v_bf = v_full.astype(jnp.bfloat16)
        for hh in range(num_heads):        # one-off repack to (H, S, d_head)
            lo = hh * d_head
            k_scr[hh] = k_bf[:, lo:lo + d_head]
            v_scr[hh] = v_bf[:, lo:lo + d_head]

    # ---- Q projection for this query tile: full-width, scale folded in ----
    row0 = pl.multiple_of(qi * q_block, q_block)
    xq_bf = x_ref[0, pl.ds(row0, q_block), :]                          # (Sq, D) bf16
    q_full = (jnp.dot(xq_bf, wq_ref[...],
                      preferred_element_type=jnp.float32) + bq_ref[...]) * scale
    q_bf = q_full.astype(jnp.bfloat16)
    for hh in range(num_heads):            # repack to (H, Sq, d_head)
        lo = hh * d_head
        q_scr[hh] = q_bf[:, lo:lo + d_head]

    # ---- Attention + fused output projection, one head at a time ----
    acc_scr[...] = jnp.zeros_like(acc_scr)

    contract_last = (((1,), (1,)), ((), ()))   # q (Sq,dh) . k (S,dh) -> (Sq,S)

    @pl.loop(0, num_heads)
    def _(h):
        qh = q_scr[h]                                                  # (Sq, dh) bf16
        kh = k_scr[h]                                                  # (S,  dh) bf16
        vh = v_scr[h]                                                  # (S,  dh) bf16

        scores = lax.dot_general(qh, kh, dimension_numbers=contract_last,
                                 preferred_element_type=jnp.float32)  # (Sq, S) f32

        # Numerically stable softmax in f32; divide -> EUP reciprocal (free slot).
        m = jnp.max(scores, axis=-1, keepdims=True)
        e = jnp.exp(scores - m)
        attn = e * pl.reciprocal(jnp.sum(e, axis=-1, keepdims=True), approx=True)
        # TODO(synk): nn.Dropout(0.1) on attn weights is identity in eval mode;
        # training-mode stochastic dropout is not reproduced here.

        ctx = jnp.dot(attn.astype(jnp.bfloat16), vh,
                      preferred_element_type=jnp.float32)              # (Sq, dh)
        acc_scr[...] += jnp.dot(ctx.astype(jnp.bfloat16), wo_ref[h],
                                preferred_element_type=jnp.float32)    # (Sq, D)

    o_ref[0] = (acc_scr[...] + bo_ref[...]).astype(o_ref.dtype)


def _required_vmem_bytes(S, D, q_block, num_heads, d_head, single_buffer_weights):
    bf, f32 = 2, 4
    wbuf = 1 if single_buffer_weights else 2
    weights = 4 * D * D * bf * wbuf + 4 * D * f32 * wbuf
    x_in = 2 * S * D * bf                       # double-buffered x block
    out = 2 * q_block * D * f32                 # double-buffered output block
    scratch = (2 * S + q_block) * num_heads * d_head * bf + q_block * D * f32
    # Rough in-kernel working set: projection temporaries + one head's scores.
    work = (2 * S * D + 3 * q_block * D + 2 * q_block * S) * f32
    return weights + x_in + out + scratch + work


def _vmem_limit_bytes(required):
    try:
        cap = pltpu.get_tpu_info().vmem_capacity_bytes   # 128 MiB v5e/v6e, 64 MiB v7x
    except Exception:
        cap = 64 * 1024 * 1024                           # conservative (v7x floor)
    lo, headroom = 32 * 1024 * 1024, 2 * 1024 * 1024
    return int(min(cap - headroom, max(lo, (required * 3) // 2)))


def multi_head_attention(x, params, num_heads, q_block=None,
                         single_buffer_weights=True):
    """x: (B, S, D) float32.  params: pre-transposed weights/biases (f32)."""
    B, S, D = x.shape
    assert D % num_heads == 0
    d_head = D // num_heads
    out_dtype = x.dtype

    # Query-tile size: whole sequence for small S, 256-row tiles otherwise.
    # TODO(synk): for very long S on v7x (64 MiB VMEM), stream K/V over a third
    # ("arbitrary") kv-tile grid axis with an online softmax instead of keeping
    # full-sequence K/V scratch resident.
    if q_block is None:
        q_block = S if S <= 256 else 256
    assert S % q_block == 0, "S must be divisible by q_block"  # TODO(synk): pad/mask ragged S
    nq = S // q_block

    # MXU operands in bf16 (halves x/weight DMA + VMEM); biases stay f32.
    x_bf = x.astype(jnp.bfloat16)
    wq = params["wq"].astype(jnp.bfloat16)
    wk = params["wk"].astype(jnp.bfloat16)
    wv = params["wv"].astype(jnp.bfloat16)
    wo = params["wo"].astype(jnp.bfloat16).reshape(num_heads, d_head, D)
    bq, bk, bv, bo = params["bq"], params["bk"], params["bv"], params["bo"]

    kernel = functools.partial(_mha_kernel, num_heads, d_head, q_block)

    # Weight/bias index maps are constant across the grid -> DMA'd once; with
    # Buffered(1) the dead second double-buffer copy is dropped as well.
    def const_spec(shape):
        kwargs = {"pipeline_mode": pl.Buffered(1)} if single_buffer_weights else {}
        return pl.BlockSpec(shape, lambda b, qi: (0,) * len(shape), **kwargs)

    grid_spec = pltpu.PrefetchScalarGridSpec(
        num_scalar_prefetch=0,
        grid=(B, nq),
        in_specs=[
            pl.BlockSpec((1, S, D), lambda b, qi: (b, 0, 0)),      # x (full seq per batch)
            const_spec((D, D)), const_spec((1, D)),                # query
            const_spec((D, D)), const_spec((1, D)),                # key
            const_spec((D, D)), const_spec((1, D)),                # value
            const_spec((num_heads, d_head, D)), const_spec((1, D)),  # out projection
        ],
        out_specs=pl.BlockSpec((1, q_block, D), lambda b, qi: (b, qi, 0)),
        scratch_shapes=[
            pltpu.VMEM((num_heads, q_block, d_head), jnp.bfloat16),  # Q (this tile)
            pltpu.VMEM((num_heads, S, d_head), jnp.bfloat16),        # K cache (per batch)
            pltpu.VMEM((num_heads, S, d_head), jnp.bfloat16),        # V cache (per batch)
            pltpu.VMEM((q_block, D), jnp.float32),                   # output accumulator
        ],
    )

    return pl.pallas_call(
        kernel,
        out_shape=jax.ShapeDtypeStruct((B, S, D), out_dtype),
        grid_spec=grid_spec,
        compiler_params=pltpu.CompilerParams(
            # Batch axis parallel (>=2 blocks keeps both v7x cores busy); the
            # query-tile axis is arbitrary so K/V scratch persists across tiles.
            dimension_semantics=("parallel", "arbitrary"),
            vmem_limit_bytes=_vmem_limit_bytes(
                _required_vmem_bytes(S, D, q_block, num_heads, d_head,
                                     single_buffer_weights)),
        ),
    )(x_bf, wq, bq, wk, bk, wv, bv, wo, bo)


def _reference_mha(x, params, num_heads):
    """Plain-JAX f32 reference matching the PyTorch forward (eval mode, no mask)."""
    B, S, D = x.shape
    dh = D // num_heads
    lin = lambda a, w, b: a @ w + b
    q = lin(x, params["wq"], params["bq"]).reshape(B, S, num_heads, dh).transpose(0, 2, 1, 3)
    k = lin(x, params["wk"], params["bk"]).reshape(B, S, num_heads, dh).transpose(0, 2, 1, 3)
    v = lin(x, params["wv"], params["bv"]).reshape(B, S, num_heads, dh).transpose(0, 2, 1, 3)
    scores = jnp.einsum("bhqd,bhkd->bhqk", q, k) / math.sqrt(dh)
    attn = jax.nn.softmax(scores, axis=-1)
    ctx = jnp.einsum("bhqk,bhkd->bhqd", attn, v)
    ctx = ctx.transpose(0, 2, 1, 3).reshape(B, S, D)
    return lin(ctx, params["wo"], params["bo"])


if __name__ == "__main__":
    B, S, D = 2, 8, 32
    NUM_HEADS = 4

    key = jax.random.PRNGKey(0)
    keys = jax.random.split(key, 9)

    scale = 1.0 / math.sqrt(D)
    params = {
        "wq": jax.random.uniform(keys[0], (D, D), jnp.float32, -scale, scale),
        "bq": jax.random.uniform(keys[1], (1, D), jnp.float32, -scale, scale),
        "wk": jax.random.uniform(keys[2], (D, D), jnp.float32, -scale, scale),
        "bk": jax.random.uniform(keys[3], (1, D), jnp.float32, -scale, scale),
        "wv": jax.random.uniform(keys[4], (D, D), jnp.float32, -scale, scale),
        "bv": jax.random.uniform(keys[5], (1, D), jnp.float32, -scale, scale),
        "wo": jax.random.uniform(keys[6], (D, D), jnp.float32, -scale, scale),
        "bo": jax.random.uniform(keys[7], (1, D), jnp.float32, -scale, scale),
    }
    x = jax.random.normal(keys[8], (B, S, D), jnp.float32)

    try:
        out = multi_head_attention(x, params, NUM_HEADS)
    except Exception:
        # Fallback if this JAX build rejects pipeline_mode=pl.Buffered(1) on the
        # constant weight specs (perf-only optimization; semantics unchanged).
        out = multi_head_attention(x, params, NUM_HEADS, single_buffer_weights=False)
    out = jax.block_until_ready(out)

    ref = _reference_mha(x, params, NUM_HEADS)
    assert out.shape == (B, S, D)
    # bf16 MXU operands + approx softmax reciprocal -> relaxed tolerance vs f32 ref.
    assert jnp.allclose(out, ref, atol=5e-2, rtol=5e-2), "mismatch vs reference"

    print("KERNEL_OK")
</pallas_src>

<mosaic_0001>
module attributes {stable_mosaic.version = 11 : i64} {
  func.func @_mha_kernel(%arg0: i32, %arg1: i32, %arg2: memref<1x8x32xbf16, #tpu.memory_space<vmem>>, %arg3: memref<32x32xbf16, #tpu.memory_space<vmem>>, %arg4: memref<1x32xf32, #tpu.memory_space<vmem>>, %arg5: memref<32x32xbf16, #tpu.memory_space<vmem>>, %arg6: memref<1x32xf32, #tpu.memory_space<vmem>>, %arg7: memref<32x32xbf16, #tpu.memory_space<vmem>>, %arg8: memref<1x32xf32, #tpu.memory_space<vmem>>, %arg9: memref<4x8x32xbf16, #tpu.memory_space<vmem>>, %arg10: memref<1x32xf32, #tpu.memory_space<vmem>>, %arg11: memref<1x8x32xf32, #tpu.memory_space<vmem>>, %arg12: memref<4x8x8xbf16, #tpu.memory_space<vmem>>, %arg13: memref<4x8x8xbf16, #tpu.memory_space<vmem>>, %arg14: memref<4x8x8xbf16, #tpu.memory_space<vmem>>, %arg15: memref<8x32xf32, #tpu.memory_space<vmem>>) attributes {dimension_semantics = [#tpu.dimension_semantics<parallel>, #tpu.dimension_semantics<arbitrary>], iteration_bounds = array<i64: 2, 1>, scalar_prefetch = 0 : i64, scratch_operands = 4 : i64, tpu.core_type = #tpu.core_type<tc>, window_params = [{transform_indices = @transform_0, window_bounds = array<i64: 1, 8, 32>}, {pipeline_mode = #tpu.pipeline_mode<synchronous>, transform_indices = @transform_1, window_bounds = array<i64: 32, 32>}, {pipeline_mode = #tpu.pipeline_mode<synchronous>, transform_indices = @transform_2, window_bounds = array<i64: 1, 32>}, {pipeline_mode = #tpu.pipeline_mode<synchronous>, transform_indices = @transform_3, window_bounds = array<i64: 32, 32>}, {pipeline_mode = #tpu.pipeline_mode<synchronous>, transform_indices = @transform_4, window_bounds = array<i64: 1, 32>}, {pipeline_mode = #tpu.pipeline_mode<synchronous>, transform_indices = @transform_5, window_bounds = array<i64: 32, 32>}, {pipeline_mode = #tpu.pipeline_mode<synchronous>, transform_indices = @transform_6, window_bounds = array<i64: 1, 32>}, {pipeline_mode = #tpu.pipeline_mode<synchronous>, transform_indices = @transform_7, window_bounds = array<i64: 4, 8, 32>}, {pipeline_mode = #tpu.pipeline_mode<synchronous>, transform_indices = @transform_8, window_bounds = array<i64: 1, 32>}, {transform_indices = @transform_9, window_bounds = array<i64: 1, 8, 32>}]} {
    %c0_i32 = arith.constant 0 : i32
    %0 = arith.cmpi eq, %arg1, %c0_i32 : i32
    %1 = arith.extui %0 : i1 to i32
    %c0_i32_0 = arith.constant 0 : i32
    %2 = arith.cmpi ne, %1, %c0_i32_0 : i32
    scf.if %2 {
      %c0_28 = arith.constant 0 : index
      %c0_29 = arith.constant 0 : index
      %c0_30 = arith.constant 0 : index
      %42 = vector.load %arg2[%c0_28, %c0_29, %c0_30] : memref<1x8x32xbf16, #tpu.memory_space<vmem>>, vector<1x8x32xbf16>
      %43 = vector.shape_cast %42 : vector<1x8x32xbf16> to vector<8x32xbf16>
      %c0_31 = arith.constant 0 : index
      %c0_32 = arith.constant 0 : index
      %44 = vector.load %arg5[%c0_31, %c0_32] : memref<32x32xbf16, #tpu.memory_space<vmem>>, vector<32x32xbf16>
      %cst_33 = arith.constant dense<0.000000e+00> : vector<8x32xf32>
      %45 = tpu.matmul %43, %44, %cst_33 {dimension_numbers = #tpu.dot_dimension_numbers<[1], [0], [0], [1], [0, 0, 1, 1], [], []>} : vector<8x32xbf16>, vector<32x32xbf16>, vector<8x32xf32> -> vector<8x32xf32>
      %c0_34 = arith.constant 0 : index
      %c0_35 = arith.constant 0 : index
      %46 = vector.load %arg6[%c0_34, %c0_35] : memref<1x32xf32, #tpu.memory_space<vmem>>, vector<1x32xf32>
      %47 = vector.broadcast %46 : vector<1x32xf32> to vector<8x32xf32>
      %48 = arith.addf %45, %47 : vector<8x32xf32>
      %c0_36 = arith.constant 0 : index
      %c0_37 = arith.constant 0 : index
      %49 = vector.load %arg7[%c0_36, %c0_37] : memref<32x32xbf16, #tpu.memory_space<vmem>>, vector<32x32xbf16>
      %cst_38 = arith.constant dense<0.000000e+00> : vector<8x32xf32>
      %50 = tpu.matmul %43, %49, %cst_38 {dimension_numbers = #tpu.dot_dimension_numbers<[1], [0], [0], [1], [0, 0, 1, 1], [], []>} : vector<8x32xbf16>, vector<32x32xbf16>, vector<8x32xf32> -> vector<8x32xf32>
      %c0_39 = arith.constant 0 : index
      %c0_40 = arith.constant 0 : index
      %51 = vector.load %arg8[%c0_39, %c0_40] : memref<1x32xf32, #tpu.memory_space<vmem>>, vector<1x32xf32>
      %52 = vector.broadcast %51 : vector<1x32xf32> to vector<8x32xf32>
      %53 = arith.addf %50, %52 : vector<8x32xf32>
      %54 = arith.truncf %48 : vector<8x32xf32> to vector<8x32xbf16>
      %55 = arith.truncf %53 : vector<8x32xf32> to vector<8x32xbf16>
      %56 = vector.extract_strided_slice %54 {offsets = [0, 0], sizes = [8, 8], strides = [1, 1]} : vector<8x32xbf16> to vector<8x8xbf16>
      %c0_41 = arith.constant 0 : index
      %c0_42 = arith.constant 0 : index
      %c0_43 = arith.constant 0 : index
      %57 = vector.load %arg13[%c0_41, %c0_42, %c0_43] : memref<4x8x8xbf16, #tpu.memory_space<vmem>>, vector<1x8x8xbf16>
      %58 = vector.shape_cast %57 : vector<1x8x8xbf16> to vector<8x8xbf16>
      %59 = vector.shape_cast %56 : vector<8x8xbf16> to vector<1x8x8xbf16>
      tpu.vector_store %arg13[%c0_41, %c0_42, %c0_43], %59 {strides = array<i32>} : memref<4x8x8xbf16, #tpu.memory_space<vmem>>, vector<1x8x8xbf16>,
      %60 = vector.extract_strided_slice %55 {offsets = [0, 0], sizes = [8, 8], strides = [1, 1]} : vector<8x32xbf16> to vector<8x8xbf16>
      %c0_44 = arith.constant 0 : index
      %c0_45 = arith.constant 0 : index
      %c0_46 = arith.constant 0 : index
      %61 = vector.load %arg14[%c0_44, %c0_45, %c0_46] : memref<4x8x8xbf16, #tpu.memory_space<vmem>>, vector<1x8x8xbf16>
      %62 = vector.shape_cast %61 : vector<1x8x8xbf16> to vector<8x8xbf16>
      %63 = vector.shape_cast %60 : vector<8x8xbf16> to vector<1x8x8xbf16>
      tpu.vector_store %arg14[%c0_44, %c0_45, %c0_46], %63 {strides = array<i32>} : memref<4x8x8xbf16, #tpu.memory_space<vmem>>, vector<1x8x8xbf16>,
      %64 = vector.extract_strided_slice %54 {offsets = [0, 8], sizes = [8, 8], strides = [1, 1]} : vector<8x32xbf16> to vector<8x8xbf16>
      %c1_47 = arith.constant 1 : index
      %c0_48 = arith.constant 0 : index
      %c0_49 = arith.constant 0 : index
      %65 = vector.load %arg13[%c1_47, %c0_48, %c0_49] : memref<4x8x8xbf16, #tpu.memory_space<vmem>>, vector<1x8x8xbf16>
      %66 = vector.shape_cast %65 : vector<1x8x8xbf16> to vector<8x8xbf16>
      %67 = vector.shape_cast %64 : vector<8x8xbf16> to vector<1x8x8xbf16>
      tpu.vector_store %arg13[%c1_47, %c0_48, %c0_49], %67 {strides = array<i32>} : memref<4x8x8xbf16, #tpu.memory_space<vmem>>, vector<1x8x8xbf16>,
      %68 = vector.extract_strided_slice %55 {offsets = [0, 8], sizes = [8, 8], strides = [1, 1]} : vector<8x32xbf16> to vector<8x8xbf16>
      %c1_50 = arith.constant 1 : index
      %c0_51 = arith.constant 0 : index
      %c0_52 = arith.constant 0 : index
      %69 = vector.load %arg14[%c1_50, %c0_51, %c0_52] : memref<4x8x8xbf16, #tpu.memory_space<vmem>>, vector<1x8x8xbf16>
      %70 = vector.shape_cast %69 : vector<1x8x8xbf16> to vector<8x8xbf16>
      %71 = vector.shape_cast %68 : vector<8x8xbf16> to vector<1x8x8xbf16>
      tpu.vector_store %arg14[%c1_50, %c0_51, %c0_52], %71 {strides = array<i32>} : memref<4x8x8xbf16, #tpu.memory_space<vmem>>, vector<1x8x8xbf16>,
      %72 = vector.extract_strided_slice %54 {offsets = [0, 16], sizes = [8, 8], strides = [1, 1]} : vector<8x32xbf16> to vector<8x8xbf16>
      %c2_53 = arith.constant 2 : index
      %c0_54 = arith.constant 0 : index
      %c0_55 = arith.constant 0 : index
      %73 = vector.load %arg13[%c2_53, %c0_54, %c0_55] : memref<4x8x8xbf16, #tpu.memory_space<vmem>>, vector<1x8x8xbf16>
      %74 = vector.shape_cast %73 : vector<1x8x8xbf16> to vector<8x8xbf16>
      %75 = vector.shape_cast %72 : vector<8x8xbf16> to vector<1x8x8xbf16>
      tpu.vector_store %arg13[%c2_53, %c0_54, %c0_55], %75 {strides = array<i32>} : memref<4x8x8xbf16, #tpu.memory_space<vmem>>, vector<1x8x8xbf16>,
      %76 = vector.extract_strided_slice %55 {offsets = [0, 16], sizes = [8, 8], strides = [1, 1]} : vector<8x32xbf16> to vector<8x8xbf16>
      %c2_56 = arith.constant 2 : index
      %c0_57 = arith.constant 0 : index
      %c0_58 = arith.constant 0 : index
      %77 = vector.load %arg14[%c2_56, %c0_57, %c0_58] : memref<4x8x8xbf16, #tpu.memory_space<vmem>>, vector<1x8x8xbf16>
      %78 = vector.shape_cast %77 : vector<1x8x8xbf16> to vector<8x8xbf16>
      %79 = vector.shape_cast %76 : vector<8x8xbf16> to vector<1x8x8xbf16>
      tpu.vector_store %arg14[%c2_56, %c0_57, %c0_58], %79 {strides = array<i32>} : memref<4x8x8xbf16, #tpu.memory_space<vmem>>, vector<1x8x8xbf16>,
      %80 = vector.extract_strided_slice %54 {offsets = [0, 24], sizes = [8, 8], strides = [1, 1]} : vector<8x32xbf16> to vector<8x8xbf16>
      %c3_59 = arith.constant 3 : index
      %c0_60 = arith.constant 0 : index
      %c0_61 = arith.constant 0 : index
      %81 = vector.load %arg13[%c3_59, %c0_60, %c0_61] : memref<4x8x8xbf16, #tpu.memory_space<vmem>>, vector<1x8x8xbf16>
      %82 = vector.shape_cast %81 : vector<1x8x8xbf16> to vector<8x8xbf16>
      %83 = vector.shape_cast %80 : vector<8x8xbf16> to vector<1x8x8xbf16>
      tpu.vector_store %arg13[%c3_59, %c0_60, %c0_61], %83 {strides = array<i32>} : memref<4x8x8xbf16, #tpu.memory_space<vmem>>, vector<1x8x8xbf16>,
      %84 = vector.extract_strided_slice %55 {offsets = [0, 24], sizes = [8, 8], strides = [1, 1]} : vector<8x32xbf16> to vector<8x8xbf16>
      %c3_62 = arith.constant 3 : index
      %c0_63 = arith.constant 0 : index
      %c0_64 = arith.constant 0 : index
      %85 = vector.load %arg14[%c3_62, %c0_63, %c0_64] : memref<4x8x8xbf16, #tpu.memory_space<vmem>>, vector<1x8x8xbf16>
      %86 = vector.shape_cast %85 : vector<1x8x8xbf16> to vector<8x8xbf16>
      %87 = vector.shape_cast %84 : vector<8x8xbf16> to vector<1x8x8xbf16>
      tpu.vector_store %arg14[%c3_62, %c0_63, %c0_64], %87 {strides = array<i32>} : memref<4x8x8xbf16, #tpu.memory_space<vmem>>, vector<1x8x8xbf16>,
    } else {
    }
    %c8_i32 = arith.constant 8 : i32
    %3 = arith.muli %arg1, %c8_i32 : i32
    %4 = tpu.assume_multiple %3, 8 : i32
    %c0 = arith.constant 0 : index
    %5 = arith.index_cast %4 : i32 to index
    %c0_1 = arith.constant 0 : index
    %6 = vector.load %arg2[%c0, %5, %c0_1] : memref<1x8x32xbf16, #tpu.memory_space<vmem>>, vector<1x8x32xbf16>
    %7 = vector.shape_cast %6 : vector<1x8x32xbf16> to vector<8x32xbf16>
    %c0_2 = arith.constant 0 : index
    %c0_3 = arith.constant 0 : index
    %8 = vector.load %arg3[%c0_2, %c0_3] : memref<32x32xbf16, #tpu.memory_space<vmem>>, vector<32x32xbf16>
    %cst = arith.constant dense<0.000000e+00> : vector<8x32xf32>
    %9 = tpu.matmul %7, %8, %cst {dimension_numbers = #tpu.dot_dimension_numbers<[1], [0], [0], [1], [0, 0, 1, 1], [], []>} : vector<8x32xbf16>, vector<32x32xbf16>, vector<8x32xf32> -> vector<8x32xf32>
    %c0_4 = arith.constant 0 : index
    %c0_5 = arith.constant 0 : index
    %10 = vector.load %arg4[%c0_4, %c0_5] : memref<1x32xf32, #tpu.memory_space<vmem>>, vector<1x32xf32>
    %11 = vector.broadcast %10 : vector<1x32xf32> to vector<8x32xf32>
    %12 = arith.addf %9, %11 : vector<8x32xf32>
    %cst_6 = arith.constant 0.353553385 : f32
    %13 = vector.broadcast %cst_6 : f32 to vector<8x32xf32>
    %14 = arith.mulf %12, %13 : vector<8x32xf32>
    %15 = arith.truncf %14 : vector<8x32xf32> to vector<8x32xbf16>
    %16 = vector.extract_strided_slice %15 {offsets = [0, 0], sizes = [8, 8], strides = [1, 1]} : vector<8x32xbf16> to vector<8x8xbf16>
    %c0_7 = arith.constant 0 : index
    %c0_8 = arith.constant 0 : index
    %c0_9 = arith.constant 0 : index
    %17 = vector.load %arg12[%c0_7, %c0_8, %c0_9] : memref<4x8x8xbf16, #tpu.memory_space<vmem>>, vector<1x8x8xbf16>
    %18 = vector.shape_cast %17 : vector<1x8x8xbf16> to vector<8x8xbf16>
    %19 = vector.shape_cast %16 : vector<8x8xbf16> to vector<1x8x8xbf16>
    tpu.vector_store %arg12[%c0_7, %c0_8, %c0_9], %19 {strides = array<i32>} : memref<4x8x8xbf16, #tpu.memory_space<vmem>>, vector<1x8x8xbf16>,
    %20 = vector.extract_strided_slice %15 {offsets = [0, 8], sizes = [8, 8], strides = [1, 1]} : vector<8x32xbf16> to vector<8x8xbf16>
    %c1 = arith.constant 1 : index
    %c0_10 = arith.constant 0 : index
    %c0_11 = arith.constant 0 : index
    %21 = vector.load %arg12[%c1, %c0_10, %c0_11] : memref<4x8x8xbf16, #tpu.memory_space<vmem>>, vector<1x8x8xbf16>
    %22 = vector.shape_cast %21 : vector<1x8x8xbf16> to vector<8x8xbf16>
    %23 = vector.shape_cast %20 : vector<8x8xbf16> to vector<1x8x8xbf16>
    tpu.vector_store %arg12[%c1, %c0_10, %c0_11], %23 {strides = array<i32>} : memref<4x8x8xbf16, #tpu.memory_space<vmem>>, vector<1x8x8xbf16>,
    %24 = vector.extract_strided_slice %15 {offsets = [0, 16], sizes = [8, 8], strides = [1, 1]} : vector<8x32xbf16> to vector<8x8xbf16>
    %c2 = arith.constant 2 : index
    %c0_12 = arith.constant 0 : index
    %c0_13 = arith.constant 0 : index
    %25 = vector.load %arg12[%c2, %c0_12, %c0_13] : memref<4x8x8xbf16, #tpu.memory_space<vmem>>, vector<1x8x8xbf16>
    %26 = vector.shape_cast %25 : vector<1x8x8xbf16> to vector<8x8xbf16>
    %27 = vector.shape_cast %24 : vector<8x8xbf16> to vector<1x8x8xbf16>
    tpu.vector_store %arg12[%c2, %c0_12, %c0_13], %27 {strides = array<i32>} : memref<4x8x8xbf16, #tpu.memory_space<vmem>>, vector<1x8x8xbf16>,
    %28 = vector.extract_strided_slice %15 {offsets = [0, 24], sizes = [8, 8], strides = [1, 1]} : vector<8x32xbf16> to vector<8x8xbf16>
    %c3 = arith.constant 3 : index
    %c0_14 = arith.constant 0 : index
    %c0_15 = arith.constant 0 : index
    %29 = vector.load %arg12[%c3, %c0_14, %c0_15] : memref<4x8x8xbf16, #tpu.memory_space<vmem>>, vector<1x8x8xbf16>
    %30 = vector.shape_cast %29 : vector<1x8x8xbf16> to vector<8x8xbf16>
    %31 = vector.shape_cast %28 : vector<8x8xbf16> to vector<1x8x8xbf16>
    tpu.vector_store %arg12[%c3, %c0_14, %c0_15], %31 {strides = array<i32>} : memref<4x8x8xbf16, #tpu.memory_space<vmem>>, vector<1x8x8xbf16>,
    %cst_16 = arith.constant 0.000000e+00 : f32
    %32 = vector.broadcast %cst_16 : f32 to vector<8x32xf32>
    %c0_17 = arith.constant 0 : index
    %c0_18 = arith.constant 0 : index
    %33 = vector.load %arg15[%c0_17, %c0_18] : memref<8x32xf32, #tpu.memory_space<vmem>>, vector<8x32xf32>
    tpu.vector_store %arg15[%c0_17, %c0_18], %32 {strides = array<i32>} : memref<8x32xf32, #tpu.memory_space<vmem>>, vector<8x32xf32>,
    %c0_i32_19 = arith.constant 0 : i32
    %c4_i32 = arith.constant 4 : i32
    %34 = arith.addi %c0_i32_19, %c4_i32 : i32
    %c1_i32 = arith.constant 1 : i32
    scf.for %arg16 = %c0_i32_19 to %34 step %c1_i32  : i32 {
      %c1_i32_28 = arith.constant 1 : i32
      %42 = arith.muli %arg16, %c1_i32_28 : i32
      %c0_i32_29 = arith.constant 0 : i32
      %43 = arith.addi %c0_i32_29, %42 : i32
      %44 = arith.index_cast %43 : i32 to index
      %c0_30 = arith.constant 0 : index
      %c0_31 = arith.constant 0 : index
      %45 = vector.load %arg12[%44, %c0_30, %c0_31] : memref<4x8x8xbf16, #tpu.memory_space<vmem>>, vector<1x8x8xbf16>
      %46 = vector.shape_cast %45 : vector<1x8x8xbf16> to vector<8x8xbf16>
      %47 = arith.index_cast %43 : i32 to index
      %c0_32 = arith.constant 0 : index
      %c0_33 = arith.constant 0 : index
      %48 = vector.load %arg13[%47, %c0_32, %c0_33] : memref<4x8x8xbf16, #tpu.memory_space<vmem>>, vector<1x8x8xbf16>
      %49 = vector.shape_cast %48 : vector<1x8x8xbf16> to vector<8x8xbf16>
      %50 = arith.index_cast %43 : i32 to index
      %c0_34 = arith.constant 0 : index
      %c0_35 = arith.constant 0 : index
      %51 = vector.load %arg14[%50, %c0_34, %c0_35] : memref<4x8x8xbf16, #tpu.memory_space<vmem>>, vector<1x8x8xbf16>
      %52 = vector.shape_cast %51 : vector<1x8x8xbf16> to vector<8x8xbf16>
      %cst_36 = arith.constant dense<0.000000e+00> : vector<8x8xf32>
      %53 = tpu.matmul %46, %49, %cst_36 {dimension_numbers = #tpu.dot_dimension_numbers<[1], [1], [0], [0], [0, 0, 1, 0], [], []>} : vector<8x8xbf16>, vector<8x8xbf16>, vector<8x8xf32> -> vector<8x8xf32>
      %cst_37 = arith.constant dense<0xFF800000> : vector<8xf32>
      %54 = vector.multi_reduction <maximumf>, %53, %cst_37 [1] : vector<8x8xf32> to vector<8xf32>
      %55 = vector.shape_cast %54 : vector<8xf32> to vector<8x1xf32>
      %56 = vector.broadcast %55 : vector<8x1xf32> to vector<8x8xf32>
      %57 = arith.subf %53, %56 : vector<8x8xf32>
      %58 = math.exp %57 : vector<8x8xf32>
      %cst_38 = arith.constant dense<0.000000e+00> : vector<8xf32>
      %59 = vector.multi_reduction <add>, %58, %cst_38 [1] : vector<8x8xf32> to vector<8xf32>
      %60 = vector.shape_cast %59 : vector<8xf32> to vector<8x1xf32>
      %61 = tpu.reciprocal %60 {approx = true} : vector<8x1xf32> -> vector<8x1xf32>
      %62 = vector.broadcast %61 : vector<8x1xf32> to vector<8x8xf32>
      %63 = arith.mulf %58, %62 : vector<8x8xf32>
      %64 = arith.truncf %63 : vector<8x8xf32> to vector<8x8xbf16>
      %cst_39 = arith.constant dense<0.000000e+00> : vector<8x8xf32>
      %65 = tpu.matmul %64, %52, %cst_39 {dimension_numbers = #tpu.dot_dimension_numbers<[1], [0], [0], [1], [0, 0, 1, 1], [], []>} : vector<8x8xbf16>, vector<8x8xbf16>, vector<8x8xf32> -> vector<8x8xf32>
      %c0_40 = arith.constant 0 : index
      %c0_41 = arith.constant 0 : index
      %66 = vector.load %arg15[%c0_40, %c0_41] : memref<8x32xf32, #tpu.memory_space<vmem>>, vector<8x32xf32>
      %67 = arith.truncf %65 : vector<8x8xf32> to vector<8x8xbf16>
      %68 = arith.index_cast %43 : i32 to index
      %c0_42 = arith.constant 0 : index
      %c0_43 = arith.constant 0 : index
      %69 = vector.load %arg9[%68, %c0_42, %c0_43] : memref<4x8x32xbf16, #tpu.memory_space<vmem>>, vector<1x8x32xbf16>
      %70 = vector.shape_cast %69 : vector<1x8x32xbf16> to vector<8x32xbf16>
      %cst_44 = arith.constant dense<0.000000e+00> : vector<8x32xf32>
      %71 = tpu.matmul %67, %70, %cst_44 {dimension_numbers = #tpu.dot_dimension_numbers<[1], [0], [0], [1], [0, 0, 1, 1], [], []>} : vector<8x8xbf16>, vector<8x32xbf16>, vector<8x32xf32> -> vector<8x32xf32>
      %72 = arith.addf %66, %71 : vector<8x32xf32>
      %c0_45 = arith.constant 0 : index
      %c0_46 = arith.constant 0 : index
      %73 = vector.load %arg15[%c0_45, %c0_46] : memref<8x32xf32, #tpu.memory_space<vmem>>, vector<8x32xf32>
      tpu.vector_store %arg15[%c0_45, %c0_46], %72 {strides = array<i32>} : memref<8x32xf32, #tpu.memory_space<vmem>>, vector<8x32xf32>,
    }
    %c4_i32_20 = arith.constant 4 : i32
    %c0_21 = arith.constant 0 : index
    %c0_22 = arith.constant 0 : index
    %35 = vector.load %arg15[%c0_21, %c0_22] : memref<8x32xf32, #tpu.memory_space<vmem>>, vector<8x32xf32>
    %c0_23 = arith.constant 0 : index
    %c0_24 = arith.constant 0 : index
    %36 = vector.load %arg10[%c0_23, %c0_24] : memref<1x32xf32, #tpu.memory_space<vmem>>, vector<1x32xf32>
    %37 = vector.broadcast %36 : vector<1x32xf32> to vector<8x32xf32>
    %38 = arith.addf %35, %37 : vector<8x32xf32>
    %c0_25 = arith.constant 0 : index
    %c0_26 = arith.constant 0 : index
    %c0_27 = arith.constant 0 : index
    %39 = vector.load %arg11[%c0_25, %c0_26, %c0_27] : memref<1x8x32xf32, #tpu.memory_space<vmem>>, vector<1x8x32xf32>
    %40 = vector.shape_cast %39 : vector<1x8x32xf32> to vector<8x32xf32>
    %41 = vector.shape_cast %38 : vector<8x32xf32> to vector<1x8x32xf32>
    tpu.vector_store %arg11[%c0_25, %c0_26, %c0_27], %41 {strides = array<i32>} : memref<1x8x32xf32, #tpu.memory_space<vmem>>, vector<1x8x32xf32>,
    return
  }
  func.func @transform_0(%arg0: i32, %arg1: i32) -> (i32, i32, i32) {
    %c0_i32 = arith.constant 0 : i32
    %c0_i32_0 = arith.constant 0 : i32
    %c0_i32_1 = arith.constant 0 : i32
    return %arg0, %c0_i32, %c0_i32_0 : i32, i32, i32
  }
  func.func @transform_1(%arg0: i32, %arg1: i32) -> (i32, i32) {
    %c0_i32 = arith.constant 0 : i32
    %c0_i32_0 = arith.constant 0 : i32
    %c0_i32_1 = arith.constant 0 : i32
    return %c0_i32, %c0_i32_0 : i32, i32
  }
  func.func @transform_2(%arg0: i32, %arg1: i32) -> (i32, i32) {
    %c0_i32 = arith.constant 0 : i32
    %c0_i32_0 = arith.constant 0 : i32
    %c0_i32_1 = arith.constant 0 : i32
    return %c0_i32, %c0_i32_0 : i32, i32
  }
  func.func @transform_3(%arg0: i32, %arg1: i32) -> (i32, i32) {
    %c0_i32 = arith.constant 0 : i32
    %c0_i32_0 = arith.constant 0 : i32
    %c0_i32_1 = arith.constant 0 : i32
    return %c0_i32, %c0_i32_0 : i32, i32
  }
  func.func @transform_4(%arg0: i32, %arg1: i32) -> (i32, i32) {
    %c0_i32 = arith.constant 0 : i32
    %c0_i32_0 = arith.constant 0 : i32
    %c0_i32_1 = arith.constant 0 : i32
    return %c0_i32, %c0_i32_0 : i32, i32
  }
  func.func @transform_5(%arg0: i32, %arg1: i32) -> (i32, i32) {
    %c0_i32 = arith.constant 0 : i32
    %c0_i32_0 = arith.constant 0 : i32
    %c0_i32_1 = arith.constant 0 : i32
    return %c0_i32, %c0_i32_0 : i32, i32
  }
  func.func @transform_6(%arg0: i32, %arg1: i32) -> (i32, i32) {
    %c0_i32 = arith.constant 0 : i32
    %c0_i32_0 = arith.constant 0 : i32
    %c0_i32_1 = arith.constant 0 : i32
    return %c0_i32, %c0_i32_0 : i32, i32
  }
  func.func @transform_7(%arg0: i32, %arg1: i32) -> (i32, i32, i32) {
    %c0_i32 = arith.constant 0 : i32
    %c0_i32_0 = arith.constant 0 : i32
    %c0_i32_1 = arith.constant 0 : i32
    %c0_i32_2 = arith.constant 0 : i32
    return %c0_i32, %c0_i32_0, %c0_i32_1 : i32, i32, i32
  }
  func.func @transform_8(%arg0: i32, %arg1: i32) -> (i32, i32) {
    %c0_i32 = arith.constant 0 : i32
    %c0_i32_0 = arith.constant 0 : i32
    %c0_i32_1 = arith.constant 0 : i32
    return %c0_i32, %c0_i32_0 : i32, i32
  }
  func.func @transform_9(%arg0: i32, %arg1: i32) -> (i32, i32, i32) {
    %c0_i32 = arith.constant 0 : i32
    %c0_i32_0 = arith.constant 0 : i32
    return %arg0, %arg1, %c0_i32 : i32, i32, i32
  }
}

module attributes {stable_mosaic.version = 11 : i64} {
  func.func @_mha_kernel(%arg0: i32, %arg1: i32, %arg2: memref<1x8x32xbf16, #tpu.memory_space<vmem>>, %arg3: memref<32x32xbf16, #tpu.memory_space<vmem>>, %arg4: memref<1x32xf32, #tpu.memory_space<vmem>>, %arg5: memref<32x32xbf16, #tpu.memory_space<vmem>>, %arg6: memref<1x32xf32, #tpu.memory_space<vmem>>, %arg7: memref<32x32xbf16, #tpu.memory_space<vmem>>, %arg8: memref<1x32xf32, #tpu.memory_space<vmem>>, %arg9: memref<4x8x32xbf16, #tpu.memory_space<vmem>>, %arg10: memref<1x32xf32, #tpu.memory_space<vmem>>, %arg11: memref<1x8x32xf32, #tpu.memory_space<vmem>>, %arg12: memref<4x8x8xbf16, #tpu.memory_space<vmem>>, %arg13: memref<4x8x8xbf16, #tpu.memory_space<vmem>>, %arg14: memref<4x8x8xbf16, #tpu.memory_space<vmem>>, %arg15: memref<8x32xf32, #tpu.memory_space<vmem>>) attributes {dimension_semantics = [#tpu.dimension_semantics<parallel>, #tpu.dimension_semantics<arbitrary>], iteration_bounds = array<i64: 2, 1>, scalar_prefetch = 0 : i64, scratch_operands = 4 : i64, tpu.core_type = #tpu.core_type<tc>, window_params = [{transform_indices = @transform_0, window_bounds = array<i64: 1, 8, 32>}, {pipeline_mode = #tpu.pipeline_mode<synchronous>, transform_indices = @transform_1, window_bounds = array<i64: 32, 32>}, {pipeline_mode = #tpu.pipeline_mode<synchronous>, transform_indices = @transform_2, window_bounds = array<i64: 1, 32>}, {pipeline_mode = #tpu.pipeline_mode<synchronous>, transform_indices = @transform_3, window_bounds = array<i64: 32, 32>}, {pipeline_mode = #tpu.pipeline_mode<synchronous>, transform_indices = @transform_4, window_bounds = array<i64: 1, 32>}, {pipeline_mode = #tpu.pipeline_mode<synchronous>, transform_indices = @transform_5, window_bounds = array<i64: 32, 32>}, {pipeline_mode = #tpu.pipeline_mode<synchronous>, transform_indices = @transform_6, window_bounds = array<i64: 1, 32>}, {pipeline_mode = #tpu.pipeline_mode<synchronous>, transform_indices = @transform_7, window_bounds = array<i64: 4, 8, 32>}, {pipeline_mode = #tpu.pipeline_mode<synchronous>, transform_indices = @transform_8, window_bounds = array<i64: 1, 32>}, {transform_indices = @transform_9, window_bounds = array<i64: 1, 8, 32>}]} {
    %c0_i32 = arith.constant 0 : i32
    %0 = arith.cmpi eq, %arg1, %c0_i32 : i32
    %1 = arith.extui %0 : i1 to i32
    %c0_i32_0 = arith.constant 0 : i32
    %2 = arith.cmpi ne, %1, %c0_i32_0 : i32
    scf.if %2 {
      %c0_28 = arith.constant 0 : index
      %c0_29 = arith.constant 0 : index
      %c0_30 = arith.constant 0 : index
      %42 = vector.load %arg2[%c0_28, %c0_29, %c0_30] : memref<1x8x32xbf16, #tpu.memory_space<vmem>>, vector<1x8x32xbf16>
      %43 = vector.shape_cast %42 : vector<1x8x32xbf16> to vector<8x32xbf16>
      %c0_31 = arith.constant 0 : index
      %c0_32 = arith.constant 0 : index
      %44 = vector.load %arg5[%c0_31, %c0_32] : memref<32x32xbf16, #tpu.memory_space<vmem>>, vector<32x32xbf16>
      %cst_33 = arith.constant dense<0.000000e+00> : vector<8x32xf32>
      %45 = tpu.matmul %43, %44, %cst_33 {dimension_numbers = #tpu.dot_dimension_numbers<[1], [0], [0], [1], [0, 0, 1, 1], [], []>} : vector<8x32xbf16>, vector<32x32xbf16>, vector<8x32xf32> -> vector<8x32xf32>
      %c0_34 = arith.constant 0 : index
      %c0_35 = arith.constant 0 : index
      %46 = vector.load %arg6[%c0_34, %c0_35] : memref<1x32xf32, #tpu.memory_space<vmem>>, vector<1x32xf32>
      %47 = vector.broadcast %46 : vector<1x32xf32> to vector<8x32xf32>
      %48 = arith.addf %45, %47 : vector<8x32xf32>
      %c0_36 = arith.constant 0 : index
      %c0_37 = arith.constant 0 : index
      %49 = vector.load %arg7[%c0_36, %c0_37] : memref<32x32xbf16, #tpu.memory_space<vmem>>, vector<32x32xbf16>
      %cst_38 = arith.constant dense<0.000000e+00> : vector<8x32xf32>
      %50 = tpu.matmul %43, %49, %cst_38 {dimension_numbers = #tpu.dot_dimension_numbers<[1], [0], [0], [1], [0, 0, 1, 1], [], []>} : vector<8x32xbf16>, vector<32x32xbf16>, vector<8x32xf32> -> vector<8x32xf32>
      %c0_39 = arith.constant 0 : index
      %c0_40 = arith.constant 0 : index
      %51 = vector.load %arg8[%c0_39, %c0_40] : memref<1x32xf32, #tpu.memory_space<vmem>>, vector<1x32xf32>
      %52 = vector.broadcast %51 : vector<1x32xf32> to vector<8x32xf32>
      %53 = arith.addf %50, %52 : vector<8x32xf32>
      %54 = arith.truncf %48 : vector<8x32xf32> to vector<8x32xbf16>
      %55 = arith.truncf %53 : vector<8x32xf32> to vector<8x32xbf16>
      %56 = vector.extract_strided_slice %54 {offsets = [0, 0], sizes = [8, 8], strides = [1, 1]} : vector<8x32xbf16> to vector<8x8xbf16>
      %c0_41 = arith.constant 0 : index
      %c0_42 = arith.constant 0 : index
      %c0_43 = arith.constant 0 : index
      %57 = vector.load %arg13[%c0_41, %c0_42, %c0_43] : memref<4x8x8xbf16, #tpu.memory_space<vmem>>, vector<1x8x8xbf16>
      %58 = vector.shape_cast %57 : vector<1x8x8xbf16> to vector<8x8xbf16>
      %59 = vector.shape_cast %56 : vector<8x8xbf16> to vector<1x8x8xbf16>
      tpu.vector_store %arg13[%c0_41, %c0_42, %c0_43], %59 {strides = array<i32>} : memref<4x8x8xbf16, #tpu.memory_space<vmem>>, vector<1x8x8xbf16>,
      %60 = vector.extract_strided_slice %55 {offsets = [0, 0], sizes = [8, 8], strides = [1, 1]} : vector<8x32xbf16> to vector<8x8xbf16>
      %c0_44 = arith.constant 0 : index
      %c0_45 = arith.constant 0 : index
      %c0_46 = arith.constant 0 : index
      %61 = vector.load %arg14[%c0_44, %c0_45, %c0_46] : memref<4x8x8xbf16, #tpu.memory_space<vmem>>, vector<1x8x8xbf16>
      %62 = vector.shape_cast %61 : vector<1x8x8xbf16> to vector<8x8xbf16>
      %63 = vector.shape_cast %60 : vector<8x8xbf16> to vector<1x8x8xbf16>
      tpu.vector_store %arg14[%c0_44, %c0_45, %c0_46], %63 {strides = array<i32>} : memref<4x8x8xbf16, #tpu.memory_space<vmem>>, vector<1x8x8xbf16>,
      %64 = vector.extract_strided_slice %54 {offsets = [0, 8], sizes = [8, 8], strides = [1, 1]} : vector<8x32xbf16> to vector<8x8xbf16>
      %c1_47 = arith.constant 1 : index
      %c0_48 = arith.constant 0 : index
      %c0_49 = arith.constant 0 : index
      %65 = vector.load %arg13[%c1_47, %c0_48, %c0_49] : memref<4x8x8xbf16, #tpu.memory_space<vmem>>, vector<1x8x8xbf16>
      %66 = vector.shape_cast %65 : vector<1x8x8xbf16> to vector<8x8xbf16>
      %67 = vector.shape_cast %64 : vector<8x8xbf16> to vector<1x8x8xbf16>
      tpu.vector_store %arg13[%c1_47, %c0_48, %c0_49], %67 {strides = array<i32>} : memref<4x8x8xbf16, #tpu.memory_space<vmem>>, vector<1x8x8xbf16>,
      %68 = vector.extract_strided_slice %55 {offsets = [0, 8], sizes = [8, 8], strides = [1, 1]} : vector<8x32xbf16> to vector<8x8xbf16>
      %c1_50 = arith.constant 1 : index
      %c0_51 = arith.constant 0 : index
      %c0_52 = arith.constant 0 : index
      %69 = vector.load %arg14[%c1_50, %c0_51, %c0_52] : memref<4x8x8xbf16, #tpu.memory_space<vmem>>, vector<1x8x8xbf16>
      %70 = vector.shape_cast %69 : vector<1x8x8xbf16> to vector<8x8xbf16>
      %71 = vector.shape_cast %68 : vector<8x8xbf16> to vector<1x8x8xbf16>
      tpu.vector_store %arg14[%c1_50, %c0_51, %c0_52], %71 {strides = array<i32>} : memref<4x8x8xbf16, #tpu.memory_space<vmem>>, vector<1x8x8xbf16>,
      %72 = vector.extract_strided_slice %54 {offsets = [0, 16], sizes = [8, 8], strides = [1, 1]} : vector<8x32xbf16> to vector<8x8xbf16>
      %c2_53 = arith.constant 2 : index
      %c0_54 = arith.constant 0 : index
      %c0_55 = arith.constant 0 : index
      %73 = vector.load %arg13[%c2_53, %c0_54, %c0_55] : memref<4x8x8xbf16, #tpu.memory_space<vmem>>, vector<1x8x8xbf16>
      %74 = vector.shape_cast %73 : vector<1x8x8xbf16> to vector<8x8xbf16>
      %75 = vector.shape_cast %72 : vector<8x8xbf16> to vector<1x8x8xbf16>
      tpu.vector_store %arg13[%c2_53, %c0_54, %c0_55], %75 {strides = array<i32>} : memref<4x8x8xbf16, #tpu.memory_space<vmem>>, vector<1x8x8xbf16>,
      %76 = vector.extract_strided_slice %55 {offsets = [0, 16], sizes = [8, 8], strides = [1, 1]} : vector<8x32xbf16> to vector<8x8xbf16>
      %c2_56 = arith.constant 2 : index
      %c0_57 = arith.constant 0 : index
      %c0_58 = arith.constant 0 : index
      %77 = vector.load %arg14[%c2_56, %c0_57, %c0_58] : memref<4x8x8xbf16, #tpu.memory_space<vmem>>, vector<1x8x8xbf16>
      %78 = vector.shape_cast %77 : vector<1x8x8xbf16> to vector<8x8xbf16>
      %79 = vector.shape_cast %76 : vector<8x8xbf16> to vector<1x8x8xbf16>
      tpu.vector_store %arg14[%c2_56, %c0_57, %c0_58], %79 {strides = array<i32>} : memref<4x8x8xbf16, #tpu.memory_space<vmem>>, vector<1x8x8xbf16>,
      %80 = vector.extract_strided_slice %54 {offsets = [0, 24], sizes = [8, 8], strides = [1, 1]} : vector<8x32xbf16> to vector<8x8xbf16>
      %c3_59 = arith.constant 3 : index
      %c0_60 = arith.constant 0 : index
      %c0_61 = arith.constant 0 : index
      %81 = vector.load %arg13[%c3_59, %c0_60, %c0_61] : memref<4x8x8xbf16, #tpu.memory_space<vmem>>, vector<1x8x8xbf16>
      %82 = vector.shape_cast %81 : vector<1x8x8xbf16> to vector<8x8xbf16>
      %83 = vector.shape_cast %80 : vector<8x8xbf16> to vector<1x8x8xbf16>
      tpu.vector_store %arg13[%c3_59, %c0_60, %c0_61], %83 {strides = array<i32>} : memref<4x8x8xbf16, #tpu.memory_space<vmem>>, vector<1x8x8xbf16>,
      %84 = vector.extract_strided_slice %55 {offsets = [0, 24], sizes = [8, 8], strides = [1, 1]} : vector<8x32xbf16> to vector<8x8xbf16>
      %c3_62 = arith.constant 3 : index
      %c0_63 = arith.constant 0 : index
      %c0_64 = arith.constant 0 : index
      %85 = vector.load %arg14[%c3_62, %c0_63, %c0_64] : memref<4x8x8xbf16, #tpu.memory_space<vmem>>, vector<1x8x8xbf16>
      %86 = vector.shape_cast %85 : vector<1x8x8xbf16> to vector<8x8xbf16>
      %87 = vector.shape_cast %84 : vector<8x8xbf16> to vector<1x8x8xbf16>
      tpu.vector_store %arg14[%c3_62, %c0_63, %c0_64], %87 {strides = array<i32>} : memref<4x8x8xbf16, #tpu.memory_space<vmem>>, vector<1x8x8xbf16>,
    } else {
    }
    %c8_i32 = arith.constant 8 : i32
    %3 = arith.muli %arg1, %c8_i32 : i32
    %4 = tpu.assume_multiple %3, 8 : i32
    %c0 = arith.constant 0 : index
    %5 = arith.index_cast %4 : i32 to index
    %c0_1 = arith.constant 0 : index
    %6 = vector.load %arg2[%c0, %5, %c0_1] : memref<1x8x32xbf16, #tpu.memory_space<vmem>>, vector<1x8x32xbf16>
    %7 = vector.shape_cast %6 : vector<1x8x32xbf16> to vector<8x32xbf16>
    %c0_2 = arith.constant 0 : index
    %c0_3 = arith.constant 0 : index
    %8 = vector.load %arg3[%c0_2, %c0_3] : memref<32x32xbf16, #tpu.memory_space<vmem>>, vector<32x32xbf16>
    %cst = arith.constant dense<0.000000e+00> : vector<8x32xf32>
    %9 = tpu.matmul %7, %8, %cst {dimension_numbers = #tpu.dot_dimension_numbers<[1], [0], [0], [1], [0, 0, 1, 1], [], []>} : vector<8x32xbf16>, vector<32x32xbf16>, vector<8x32xf32> -> vector<8x32xf32>
    %c0_4 = arith.constant 0 : index
    %c0_5 = arith.constant 0 : index
    %10 = vector.load %arg4[%c0_4, %c0_5] : memref<1x32xf32, #tpu.memory_space<vmem>>, vector<1x32xf32>
    %11 = vector.broadcast %10 : vector<1x32xf32> to vector<8x32xf32>
    %12 = arith.addf %9, %11 : vector<8x32xf32>
    %cst_6 = arith.constant 0.353553385 : f32
    %13 = vector.broadcast %cst_6 : f32 to vector<8x32xf32>
    %14 = arith.mulf %12, %13 : vector<8x32xf32>
    %15 = arith.truncf %14 : vector<8x32xf32> to vector<8x32xbf16>
    %16 = vector.extract_strided_slice %15 {offsets = [0, 0], sizes = [8, 8], strides = [1, 1]} : vector<8x32xbf16> to vector<8x8xbf16>
    %c0_7 = arith.constant 0 : index
    %c0_8 = arith.constant 0 : index
    %c0_9 = arith.constant 0 : index
    %17 = vector.load %arg12[%c0_7, %c0_8, %c0_9] : memref<4x8x8xbf16, #tpu.memory_space<vmem>>, vector<1x8x8xbf16>
    %18 = vector.shape_cast %17 : vector<1x8x8xbf16> to vector<8x8xbf16>
    %19 = vector.shape_cast %16 : vector<8x8xbf16> to vector<1x8x8xbf16>
    tpu.vector_store %arg12[%c0_7, %c0_8, %c0_9], %19 {strides = array<i32>} : memref<4x8x8xbf16, #tpu.memory_space<vmem>>, vector<1x8x8xbf16>,
    %20 = vector.extract_strided_slice %15 {offsets = [0, 8], sizes = [8, 8], strides = [1, 1]} : vector<8x32xbf16> to vector<8x8xbf16>
    %c1 = arith.constant 1 : index
    %c0_10 = arith.constant 0 : index
    %c0_11 = arith.constant 0 : index
    %21 = vector.load %arg12[%c1, %c0_10, %c0_11] : memref<4x8x8xbf16, #tpu.memory_space<vmem>>, vector<1x8x8xbf16>
    %22 = vector.shape_cast %21 : vector<1x8x8xbf16> to vector<8x8xbf16>
    %23 = vector.shape_cast %20 : vector<8x8xbf16> to vector<1x8x8xbf16>
    tpu.vector_store %arg12[%c1, %c0_10, %c0_11], %23 {strides = array<i32>} : memref<4x8x8xbf16, #tpu.memory_space<vmem>>, vector<1x8x8xbf16>,
    %24 = vector.extract_strided_slice %15 {offsets = [0, 16], sizes = [8, 8], strides = [1, 1]} : vector<8x32xbf16> to vector<8x8xbf16>
    %c2 = arith.constant 2 : index
    %c0_12 = arith.constant 0 : index
    %c0_13 = arith.constant 0 : index
    %25 = vector.load %arg12[%c2, %c0_12, %c0_13] : memref<4x8x8xbf16, #tpu.memory_space<vmem>>, vector<1x8x8xbf16>
    %26 = vector.shape_cast %25 : vector<1x8x8xbf16> to vector<8x8xbf16>
    %27 = vector.shape_cast %24 : vector<8x8xbf16> to vector<1x8x8xbf16>
    tpu.vector_store %arg12[%c2, %c0_12, %c0_13], %27 {strides = array<i32>} : memref<4x8x8xbf16, #tpu.memory_space<vmem>>, vector<1x8x8xbf16>,
    %28 = vector.extract_strided_slice %15 {offsets = [0, 24], sizes = [8, 8], strides = [1, 1]} : vector<8x32xbf16> to vector<8x8xbf16>
    %c3 = arith.constant 3 : index
    %c0_14 = arith.constant 0 : index
    %c0_15 = arith.constant 0 : index
    %29 = vector.load %arg12[%c3, %c0_14, %c0_15] : memref<4x8x8xbf16, #tpu.memory_space<vmem>>, vector<1x8x8xbf16>
    %30 = vector.shape_cast %29 : vector<1x8x8xbf16> to vector<8x8xbf16>
    %31 = vector.shape_cast %28 : vector<8x8xbf16> to vector<1x8x8xbf16>
    tpu.vector_store %arg12[%c3, %c0_14, %c0_15], %31 {strides = array<i32>} : memref<4x8x8xbf16, #tpu.memory_space<vmem>>, vector<1x8x8xbf16>,
    %cst_16 = arith.constant 0.000000e+00 : f32
    %32 = vector.broadcast %cst_16 : f32 to vector<8x32xf32>
    %c0_17 = arith.constant 0 : index
    %c0_18 = arith.constant 0 : index
    %33 = vector.load %arg15[%c0_17, %c0_18] : memref<8x32xf32, #tpu.memory_space<vmem>>, vector<8x32xf32>
    tpu.vector_store %arg15[%c0_17, %c0_18], %32 {strides = array<i32>} : memref<8x32xf32, #tpu.memory_space<vmem>>, vector<8x32xf32>,
    %c0_i32_19 = arith.constant 0 : i32
    %c4_i32 = arith.constant 4 : i32
    %34 = arith.addi %c0_i32_19, %c4_i32 : i32
    %c1_i32 = arith.constant 1 : i32
    scf.for %arg16 = %c0_i32_19 to %34 step %c1_i32  : i32 {
      %c1_i32_28 = arith.constant 1 : i32
      %42 = arith.muli %arg16, %c1_i32_28 : i32
      %c0_i32_29 = arith.constant 0 : i32
      %43 = arith.addi %c0_i32_29, %42 : i32
      %44 = arith.index_cast %43 : i32 to index
      %c0_30 = arith.constant 0 : index
      %c0_31 = arith.constant 0 : index
      %45 = vector.load %arg12[%44, %c0_30, %c0_31] : memref<4x8x8xbf16, #tpu.memory_space<vmem>>, vector<1x8x8xbf16>
      %46 = vector.shape_cast %45 : vector<1x8x8xbf16> to vector<8x8xbf16>
      %47 = arith.index_cast %43 : i32 to index
      %c0_32 = arith.constant 0 : index
      %c0_33 = arith.constant 0 : index
      %48 = vector.load %arg13[%47, %c0_32, %c0_33] : memref<4x8x8xbf16, #tpu.memory_space<vmem>>, vector<1x8x8xbf16>
      %49 = vector.shape_cast %48 : vector<1x8x8xbf16> to vector<8x8xbf16>
      %50 = arith.index_cast %43 : i32 to index
      %c0_34 = arith.constant 0 : index
      %c0_35 = arith.constant 0 : index
      %51 = vector.load %arg14[%50, %c0_34, %c0_35] : memref<4x8x8xbf16, #tpu.memory_space<vmem>>, vector<1x8x8xbf16>
      %52 = vector.shape_cast %51 : vector<1x8x8xbf16> to vector<8x8xbf16>
      %cst_36 = arith.constant dense<0.000000e+00> : vector<8x8xf32>
      %53 = tpu.matmul %46, %49, %cst_36 {dimension_numbers = #tpu.dot_dimension_numbers<[1], [1], [0], [0], [0, 0, 1, 0], [], []>} : vector<8x8xbf16>, vector<8x8xbf16>, vector<8x8xf32> -> vector<8x8xf32>
      %cst_37 = arith.constant dense<0xFF800000> : vector<8xf32>
      %54 = vector.multi_reduction <maximumf>, %53, %cst_37 [1] : vector<8x8xf32> to vector<8xf32>
      %55 = vector.shape_cast %54 : vector<8xf32> to vector<8x1xf32>
      %56 = vector.broadcast %55 : vector<8x1xf32> to vector<8x8xf32>
      %57 = arith.subf %53, %56 : vector<8x8xf32>
      %58 = math.exp %57 : vector<8x8xf32>
      %cst_38 = arith.constant dense<0.000000e+00> : vector<8xf32>
      %59 = vector.multi_reduction <add>, %58, %cst_38 [1] : vector<8x8xf32> to vector<8xf32>
      %60 = vector.shape_cast %59 : vector<8xf32> to vector<8x1xf32>
      %61 = tpu.reciprocal %60 {approx = true} : vector<8x1xf32> -> vector<8x1xf32>
      %62 = vector.broadcast %61 : vector<8x1xf32> to vector<8x8xf32>
      %63 = arith.mulf %58, %62 : vector<8x8xf32>
      %64 = arith.truncf %63 : vector<8x8xf32> to vector<8x8xbf16>
      %cst_39 = arith.constant dense<0.000000e+00> : vector<8x8xf32>
      %65 = tpu.matmul %64, %52, %cst_39 {dimension_numbers = #tpu.dot_dimension_numbers<[1], [0], [0], [1], [0, 0, 1, 1], [], []>} : vector<8x8xbf16>, vector<8x8xbf16>, vector<8x8xf32> -> vector<8x8xf32>
      %c0_40 = arith.constant 0 : index
      %c0_41 = arith.constant 0 : index
      %66 = vector.load %arg15[%c0_40, %c0_41] : memref<8x32xf32, #tpu.memory_space<vmem>>, vector<8x32xf32>
      %67 = arith.truncf %65 : vector<8x8xf32> to vector<8x8xbf16>
      %68 = arith.index_cast %43 : i32 to index
      %c0_42 = arith.constant 0 : index
      %c0_43 = arith.constant 0 : index
      %69 = vector.load %arg9[%68, %c0_42, %c0_43] : memref<4x8x32xbf16, #tpu.memory_space<vmem>>, vector<1x8x32xbf16>
      %70 = vector.shape_cast %69 : vector<1x8x32xbf16> to vector<8x32xbf16>
      %cst_44 = arith.constant dense<0.000000e+00> : vector<8x32xf32>
      %71 = tpu.matmul %67, %70, %cst_44 {dimension_numbers = #tpu.dot_dimension_numbers<[1], [0], [0], [1], [0, 0, 1, 1], [], []>} : vector<8x8xbf16>, vector<8x32xbf16>, vector<8x32xf32> -> vector<8x32xf32>
      %72 = arith.addf %66, %71 : vector<8x32xf32>
      %c0_45 = arith.constant 0 : index
      %c0_46 = arith.constant 0 : index
      %73 = vector.load %arg15[%c0_45, %c0_46] : memref<8x32xf32, #tpu.memory_space<vmem>>, vector<8x32xf32>
      tpu.vector_store %arg15[%c0_45, %c0_46], %72 {strides = array<i32>} : memref<8x32xf32, #tpu.memory_space<vmem>>, vector<8x32xf32>,
    }
    %c4_i32_20 = arith.constant 4 : i32
    %c0_21 = arith.constant 0 : index
    %c0_22 = arith.constant 0 : index
    %35 = vector.load %arg15[%c0_21, %c0_22] : memref<8x32xf32, #tpu.memory_space<vmem>>, vector<8x32xf32>
    %c0_23 = arith.constant 0 : index
    %c0_24 = arith.constant 0 : index
    %36 = vector.load %arg10[%c0_23, %c0_24] : memref<1x32xf32, #tpu.memory_space<vmem>>, vector<1x32xf32>
    %37 = vector.broadcast %36 : vector<1x32xf32> to vector<8x32xf32>
    %38 = arith.addf %35, %37 : vector<8x32xf32>
    %c0_25 = arith.constant 0 : index
    %c0_26 = arith.constant 0 : index
    %c0_27 = arith.constant 0 : index
    %39 = vector.load %arg11[%c0_25, %c0_26, %c0_27] : memref<1x8x32xf32, #tpu.memory_space<vmem>>, vector<1x8x32xf32>
    %40 = vector.shape_cast %39 : vector<1x8x32xf32> to vector<8x32xf32>
    %41 = vector.shape_cast %38 : vector<8x32xf32> to vector<1x8x32xf32>
    tpu.vector_store %arg11[%c0_25, %c0_26, %c0_27], %41 {strides = array<i32>} : memref<1x8x32xf32, #tpu.memory_space<vmem>>, vector<1x8x32xf32>,
    return
  }
  func.func @transform_0(%arg0: i32, %arg1: i32) -> (i32, i32, i32) {
    %c0_i32 = arith.constant 0 : i32
    %c0_i32_0 = arith.constant 0 : i32
    %c0_i32_1 = arith.constant 0 : i32
    return %arg0, %c0_i32, %c0_i32_0 : i32, i32, i32
  }
  func.func @transform_1(%arg0: i32, %arg1: i32) -> (i32, i32) {
    %c0_i32 = arith.constant 0 : i32
    %c0_i32_0 = arith.constant 0 : i32
    %c0_i32_1 = arith.constant 0 : i32
    return %c0_i32, %c0_i32_0 : i32, i32
  }
  func.func @transform_2(%arg0: i32, %arg1: i32) -> (i32, i32) {
    %c0_i32 = arith.constant 0 : i32
    %c0_i32_0 = arith.constant 0 : i32
    %c0_i32_1 = arith.constant 0 : i32
    return %c0_i32, %c0_i32_0 : i32, i32
  }
  func.func @transform_3(%arg0: i32, %arg1: i32) -> (i32, i32) {
    %c0_i32 = arith.constant 0 : i32
    %c0_i32_0 = arith.constant 0 : i32
    %c0_i32_1 = arith.constant 0 : i32
    return %c0_i32, %c0_i32_0 : i32, i32
  }
  func.func @transform_4(%arg0: i32, %arg1: i32) -> (i32, i32) {
    %c0_i32 = arith.constant 0 : i32
    %c0_i32_0 = arith.constant 0 : i32
    %c0_i32_1 = arith.constant 0 : i32
    return %c0_i32, %c0_i32_0 : i32, i32
  }
  func.func @transform_5(%arg0: i32, %arg1: i32) -> (i32, i32) {
    %c0_i32 = arith.constant 0 : i32
    %c0_i32_0 = arith.constant 0 : i32
    %c0_i32_1 = arith.constant 0 : i32
    return %c0_i32, %c0_i32_0 : i32, i32
  }
  func.func @transform_6(%arg0: i32, %arg1: i32) -> (i32, i32) {
    %c0_i32 = arith.constant 0 : i32
    %c0_i32_0 = arith.constant 0 : i32
    %c0_i32_1 = arith.constant 0 : i32
    return %c0_i32, %c0_i32_0 : i32, i32
  }
  func.func @transform_7(%arg0: i32, %arg1: i32) -> (i32, i32, i32) {
    %c0_i32 = arith.constant 0 : i32
    %c0_i32_0 = arith.constant 0 : i32
    %c0_i32_1 = arith.constant 0 : i32
    %c0_i32_2 = arith.constant 0 : i32
    return %c0_i32, %c0_i32_0, %c0_i32_1 : i32, i32, i32
  }
  func.func @transform_8(%arg0: i32, %arg1: i32) -> (i32, i32) {
    %c0_i32 = arith.constant 0 : i32
    %c0_i32_0 = arith.constant 0 : i32
    %c0_i32_1 = arith.constant 0 : i32
    return %c0_i32, %c0_i32_0 : i32, i32
  }
  func.func @transform_9(%arg0: i32, %arg1: i32) -> (i32, i32, i32) {
    %c0_i32 = arith.constant 0 : i32
    %c0_i32_0 = arith.constant 0 : i32
    return %arg0, %arg1, %c0_i32 : i32, i32, i32
  }
}

</mosaic_0001>

<bundles_post_ra>
// kernel: tpu_custom_call.1
= control target key start
LH: loop header
LB: loop body
LE: loop exit
PB: predicated region body
PF: predicated region fallthrough
CT: control target
= control target key end

     0   :  { %s1835_s0 = inlined_call_operand.hbm [shape: bf16[2,8,32], index: 0, kind: input, shape index: {}]   ;;  %s1836_s1 = inlined_call_operand.hbm [shape: bf16[32,32], index: 1, kind: input, shape index: {}]   ;;  %s1837_s2 = inlined_call_operand.vmem [shape: f32[1,32], index: 2, kind: input, shape index: {}]   ;;  %s1838_s3 = inlined_call_operand.hbm [shape: bf16[32,32], index: 3, kind: input, shape index: {}]   ;;  %s1839_s4 = inlined_call_operand.vmem [shape: f32[1,32], index: 4, kind: input, shape index: {}]   ;;  %s1840_s5 = inlined_call_operand.hbm [shape: bf16[32,32], index: 5, kind: input, shape index: {}]   ;;  %s1841_s6 = inlined_call_operand.vmem [shape: f32[1,32], index: 6, kind: input, shape index: {}]   ;;  %s1842_s7 = inlined_call_operand.hbm [shape: bf16[4,8,32], index: 7, kind: input, shape index: {}]   ;;  %s1843_s8 = inlined_call_operand.vmem [shape: f32[1,32], index: 8, kind: input, shape index: {}]   ;;  %s1844_s9 = inlined_call_operand.hbm [shape: f32[2,8,32], index: 9, kind: output, shape index: {}]  }
   0x1   :  { %1847 = sst [smem:[#allocation22_spill]] %s1836_s1 }
   0x2   :  { %1848 = sst [smem:[#allocation23_spill]] %s1838_s3 }
   0x3   :  { %1849 = sst [smem:[#allocation24_spill]] %s1840_s5 }
   0x4   :  { %1850 = sst [smem:[#allocation25_spill]] %s1842_s7 }
   0x5   :  { %14 = vsyncpa [#allocation7], 0 }
   0x6   :  { %16 = vsyncpa [#allocation7 + $0x1], 0 }
   0x7   :  { %17 = vsyncpa [#allocation10], 0 }
   0x8   :  { %18 = vsyncpa [#allocation13], 0 }
   0x9   :  { %19 = vsyncpa [#allocation8], 0 }
   0xa   :  { %21 = vsyncpa [#allocation8 + $0x1], 0  ;;  %s1553_s30 = smov 0   ;;  %s1555_s10 = smov 0  }
   0xb   :  { %s1557_s11 = smov 0   ;;  %s1559_s12 = smov 0  }
   0xc   :  { %s1561_s13 = smov 0   ;;  %s1563_s14 = smov 0  }
   0xd LB: > { %1851 = sst [smem:[#allocation20_spill]] %s1478_s13  ;;  %s1024_s15 = sadd.s32 4294967295, %s1482_s14   ;;  %s1482_s14 = sphi %s1563_s14, %s27_s14   ;;  %s1478_s13 = sphi %s1561_s13, %s1868_s13   ;;  %s1474_s12 = sphi %s1559_s12, %s1867_s12   ;;  %s1470_s11 = sphi %s1557_s11, %s1871_s11   ;;  %s1466_s10 = sphi %s1555_s10, %s1870_s10   ;;  %s1462_s30 = sphi %s1553_s30, %s1869_s30  }
   0xe   : > { %p1026_p0 = scmp.ge.s32.totalorder %s1482_s14, 1  ;;  %p1587_p1 = scmp.eq.s32.totalorder %s1024_s15, 0 }
   0xf   : > { %p266_p2 = scmp.lt.s32.totalorder %s1482_s14, 3  ;;  %s1488_s18 = smov [#allocation9]  }
  0x10   : > { %s278_s19 = sshll.u32 %s1488_s18, 4  ;;  %s1489_s21 = smov [#allocation12]   ;;  %s279_s19 = int_to_ptr.vmem [resolvable:$true] %s278_s19 }
  0x11   : > { %p1592_p3 = pnand %p1026_p0, %p266_p2  ;;  %s310_s22 = sshll.u32 %s1489_s21, 4  ;;  %s311_s22 = int_to_ptr.vmem [resolvable:$true] %s310_s22 }
  0x12   : > { %s1490_s23 = smov [#allocation11]   ;;  %s1269_s25 = scalar_lea.vmem %s279_s19, 256 }
  0x13   : > { %p1148_p4 = pneg %p1592_p3  ;;  %s294_s24 = sshll.u32 %s1490_s23, 4  ;;  %s295_s24 = int_to_ptr.vmem [resolvable:$true] %s294_s24 }
  0x14   : > { %p1270_p8 = scmp.ne.s32.totalorder %s279_s19, %s1269_s25  ;;  %p1277_p11 = scmp.lt.s32.totalorder %s279_s19, %s279_s19 }
  0x15   : > { %p1601_p6 = pnand %p1148_p4, %p1587_p1  ;;  %p1278_p12 = scmp.lt.s32.totalorder %s1269_s25, %s1269_s25 }
  0x17   : > { %p1260_p7 = pneg %p1601_p6  ;;  %p1279_p13 = por %p1278_p12, %p1277_p11 }
  0x19   : > { %p1272_p9 = pnand %p1270_p8, %p1260_p7 }
  0x1b   : > { %p1273_p10 = pneg %p1272_p9 }
  0x1d   : > { %p1280_p0 = pnand %p1279_p13, %p1273_p10 }
  0x1f   : > { %1283 = shalt.err (!%p1280_p0)
}
  0x20   : > { %s1491_s26 = smov 64   ;;  %s1492_s27 = smov 4  }
  0x21   : > { %s1855_s1 = sld [smem:[#allocation22_spill]]  ;;  %s1295_s18 = scalar_lea.vmem %s311_s22, 256 }
  0x22   : > { %p1296_p2 = scmp.ne.s32.totalorder %s311_s22, %s1295_s18  ;;  %p1303_p9 = scmp.lt.s32.totalorder %s311_s22, %s311_s22 }
  0x23   : > { %p1304_p10 = scmp.lt.s32.totalorder %s1295_s18, %s1295_s18 }
  0x24   : > { %p1298_p4 = pnand %p1296_p2, %p1260_p7 }
  0x25   : > { %p1305_p11 = por %p1304_p10, %p1303_p9 }
  0x26   : > { %p1299_p8 = pneg %p1298_p4 }
  0x27   : > { %1151 = dma.hbm_to_vmem [thread:$0]  (!%p1601_p6), %s1855_s1, 256, %s279_s19, [#allocation10], %s1491_s26, %s1491_s26, %s1492_s27  }
  0x28   : > { %p1306_p12 = pnand %p1305_p11, %p1299_p8 }
  0x2a   : > { %1309 = shalt.err (!%p1306_p12)
}
  0x2b   : > { %s1856_s5 = sld [smem:[#allocation24_spill]]  ;;  %s1321_s19 = scalar_lea.vmem %s295_s24, 256 }
  0x2c   : > { %p1322_p13 = scmp.ne.s32.totalorder %s295_s24, %s1321_s19  ;;  %p1329_p4 = scmp.lt.s32.totalorder %s295_s24, %s295_s24 }
  0x2d   : > { %p1330_p8 = scmp.lt.s32.totalorder %s1321_s19, %s1321_s19 }
  0x2e   : > { %p1324_p0 = pnand %p1322_p13, %p1260_p7 }
  0x2f   : > { %p1331_p9 = por %p1330_p8, %p1329_p4 }
  0x30   : > { %p1325_p2 = pneg %p1324_p0 }
  0x31   : > { %1157 = dma.hbm_to_vmem [thread:$0]  (!%p1601_p6), %s1856_s5, 256, %s311_s22, [#allocation13], %s1491_s26, %s1491_s26, %s1492_s27  }
  0x32   : > { %p1332_p10 = pnand %p1331_p9, %p1325_p2 }
  0x34   : > { %1335 = shalt.err (!%p1332_p10)
}
  0x35   : > { %s1857_s3 = sld [smem:[#allocation23_spill]]  ;;  %s1493_s22 = smov [#allocation14]  }
  0x36   : > { %s326_s29 = sshll.u32 %s1493_s22, 4  ;;  %s327_s29 = int_to_ptr.vmem [resolvable:$true] %s326_s29 }
  0x37   : > { %s1347_s18 = scalar_lea.vmem %s327_s29, 256  ;;  %p1355_p0 = scmp.lt.s32.totalorder %s327_s29, %s327_s29 }
  0x38   : > { %p1348_p11 = scmp.ne.s32.totalorder %s327_s29, %s1347_s18  ;;  %p1356_p2 = scmp.lt.s32.totalorder %s1347_s18, %s1347_s18 }
  0x3a   : > { %p1350_p12 = pnand %p1348_p11, %p1260_p7  ;;  %p1357_p4 = por %p1356_p2, %p1355_p0 }
  0x3b   : > { %1154 = dma.hbm_to_vmem [thread:$0]  (!%p1601_p6), %s1857_s3, 256, %s295_s24, [#allocation10], %s1491_s26, %s1491_s26, %s1492_s27  }
  0x3c   : > { %p1351_p13 = pneg %p1350_p12 }
  0x3e   : > { %p1358_p8 = pnand %p1357_p4, %p1351_p13 }
  0x40   : > { %1361 = shalt.err (!%p1358_p8)
}
  0x41   : > { %s1858_s7 = sld [smem:[#allocation25_spill]]  ;;  %s1025_s20 = sadd.s32 4294967294, %s1482_s14  }
  0x42   : > { %s39_s23 = sadd.s32 1, %s1478_s13  ;;  %s46_s19 = sadd.s32 1, %s1470_s11 }
  0x43   : > { %p41_p7 = scmp.ge.s32.totalorder %s39_s23, 2  ;;  %p53_p9 = scmp.ne.s32.totalorder %s1470_s11, %s1466_s10 }
  0x44   : > { %p54_p10 = scmp.eq.s32.totalorder %s1482_s14, 0  ;;  %p59_p12 = scmp.ne.s32.totalorder %s1466_s10, %s1462_s30 }
  0x45   : > { %s1873_s23 = smov (%p41_p7, %s39_s23), 0  ;;  %p259_p4 = scmp.eq.s32.totalorder %s1025_s20, 1 }
  0x46   : > { %1859 = sst [smem:[#allocation21_spill]] %s1873_s23  ;;  %p1659_p11 = por %p54_p10, %p53_p9 }
  0x47   : > { %1160 = dma.hbm_to_vmem [thread:$0]  (!%p1601_p6), %s1858_s7, 256, %s327_s29, [#allocation13], %s1491_s26, %s1491_s26, %s1492_s27  }
  0x48   : > { %s43_s26 = ssub.s32 %s1478_s13, %s1873_s23  ;;  %p253_p6 = scmp.eq.s32.totalorder %s1024_s15, 1 }
  0x49   : > { %p44_p13 = scmp.eq.s32.totalorder %s43_s26, 0  ;;  %p1671_p0 = por %p1587_p1, %p59_p12 }
  0x4a   : > { %p1675_p2 = por %p253_p6, %p53_p9  ;;  %p1682_p8 = por %p259_p4, %p59_p12 }
  0x4b   : > { %s1680_s22 = scalar_select %p44_p13, %s1470_s11, %s46_s19  }
  0x4c   : > { %s1863_s29 = scalar_select %p1682_p8, 1, 0 }
  0x4d   : > { %p1173_p7 = scmp.lt.s32.totalorder %s1482_s14, 2  ;;  %s343_s18 = sand.u32 1, %s1470_s11  }
  0x4e   : > { %s1033_s15 = sshll.u32 %s1478_s13, 6  ;;  %s1032_s24 = sshll.u32 %s343_s18, 2 }
  0x4f   : > { %s352_s1 = scalar_lea.hbm %s1835_s0, %s1033_s15  ;;  %s347_s3 = scalar_lea.vmem [#allocation6], %s1032_s24 }
  0x50   : > { %s354_s5 = sshll.u32 %s347_s3, 4  ;;  %p1694_p9 = pnand %p1173_p7, %p1659_p11  ;;  %s355_s5 = int_to_ptr.vmem [resolvable:$true] %s354_s5 }
  0x51   : > { %s344_s20 = scalar_lea.sflag [#allocation7], %s343_s18  ;;  %s1375_s19 = scalar_lea.vmem %s355_s5, 64 }
  0x52   : > { %p1364_p10 = pneg %p1694_p9  ;;  %p1376_p12 = scmp.ne.s32.totalorder %s355_s5, %s1375_s19 }
  0x53   : > { %s1494_s23 = smov [#allocation6]  }
  0x54   : > { %p1378_p6 = pnand %p1376_p12, %p1364_p10  ;;  %s1380_s13 = sshll.u32 %s1494_s23, 4  ;;  %s1381_s13 = int_to_ptr.vmem [resolvable:$false] %s1380_s13 }
  0x55   : > { %s1382_s15 = scalar_lea.vmem %s1381_s13, 128  ;;  %p1383_p4 = scmp.lt.s32.totalorder %s355_s5, %s1381_s13 }
  0x56   : > { %p1379_p13 = pneg %p1378_p6  ;;  %p1384_p5 = scmp.lt.s32.totalorder %s1382_s15, %s1375_s19 }
  0x58   : > { %p1385_p8 = por %p1384_p5, %p1383_p4 }
  0x5a   : > { %p1386_p11 = pnand %p1385_p8, %p1379_p13 }
  0x5c   : > { %1389 = shalt.err (!%p1386_p11)
}
  0x5d   : > { %1164 = dma.hbm_to_vmem [thread:$0]  (!%p1694_p9), %s352_s1, 64, %s355_s5, %s344_s20  }
  0x5e   : > { %363 = sbr.rel (%p1592_p3) target bundleno = 1374 (0x55e), region = 56  ;;  %s1705_s3 = sand.u32 (!%p1592_p3), 1, %s1466_s10  }
  0x5f   : > { %s1035_s23 = sshll.u32 (!%p1592_p3), %s1705_s3, 2  ;;  %s366_s25 = scalar_lea.sflag (!%p1592_p3), [#allocation7], %s1705_s3 }
  0x60   : > { %s1709_s18 = scalar_lea.vmem (!%p1592_p3), [#allocation6], %s1035_s23 }
  0x63   : > { %1445 = dma.done.wait (%p1671_p0), %s366_s25, 64  }
  0x64   : > { %1447 = vsyncadd (%p1671_p0), %s366_s25, 4294967232 }
  0x65   : > { %1449 = dma.done.wait (%p1587_p1), [#allocation10], 512  }
  0x66   : > { %1451 = vsyncadd (%p1587_p1), [#allocation10], 4294966784 }
  0x67   : > { %1453 = dma.done.wait (%p1587_p1), [#allocation13], 512  }
  0x68   : > { %1455 = vsyncadd (%p1587_p1), [#allocation13], 4294966784  ;;  %s1040_s1 = sshll.u32 %s1705_s3, 3  ;;  %vm449_vm0 = vcmask 261120   ;;  %v1495_v0 = vmov 0.0   ;;  %vm1496_vm1 = vmmov 0  }
  0x69   : > { %1086 = vmatprep.subr.bf16.mxu0 %v1495_v0  ;;  %1094 = vmatprep.subr.bf16.mxu1 %v1495_v0  ;;  %692 = vst.msk [vmem:[#allocation5] sm:$0xff] %vm449_vm0, %v1495_v0  ;;  %v1248_v1 = vld [vmem:[#allocation11 + $0x8] sm:$0xff]   ;;  %v1249_v2 = vld [vmem:[#allocation12 + $0x8] sm:$0xff]   ;;  %v1250_v3 = vld [vmem:[#allocation11] sm:$0xff]   ;;  %vm558_vm2 = vcmask 60416   ;;  %s1497_s17 = smov 112  }
  0x6a   : > { %1090 = vmatprep.mubr.msk.bf16.mxu0 %vm1496_vm1, %v1495_v0  ;;  %1098 = vmatprep.mubr.msk.bf16.mxu1 %vm1496_vm1, %v1495_v0  ;;  %v1251_v4 = vld [vmem:[#allocation12] sm:$0xff]   ;;  %v425_v5 = vld [vmem:[%s1709_s18] sm:$0xf]  ;;  %v1252_v6 = vld [vmem:[#allocation9 + $0x8] sm:$0xff]   ;;  %s1498_s27 = smov 120   ;;  %s1499_s26 = smov 104  }
  0x6b   : > { %1087 = vmatpush3.bf16.msra.mxu0 %v1248_v1  ;;  %1095 = vmatpush3.bf16.msra.mxu1 %v1249_v2  ;;  %v1253_v7 = vld [vmem:[#allocation9] sm:$0xff]   ;;  %v602_v8 = vld [vmem:[%s1709_s18] sm:$0xf]  ;;  %s1756_s20 = scalar_lea.vmem [#allocation15], %s1040_s1  ;;  %s1758_s19 = smov 0  }
  0x6c   : > { %1088 = vmatprep.subr.bf16.mxu0 %v1495_v0  ;;  %1096 = vmatprep.subr.bf16.mxu1 %v1495_v0  ;;  %v1041_v9 = vld [vmem:[%s1839_s4] ss:$0 sm:$0xff] }
  0x6d   : > { %v1045_v10 = vld [vmem:[%s1841_s6] ss:$0 sm:$0xff] }
  0x6e   : > { %v1051_v22 = vld [vmem:[%s1837_s2] ss:$0 sm:$0xff] }
  0x6f   : > { %1089 = vmatpush3.bf16.msra.mxu0 %v1250_v3  ;;  %1097 = vmatpush3.bf16.msra.mxu1 %v1251_v4 }
  0x70   : > { %1102 = vmatprep.subr.bf16.mxu0 %v1495_v0 }
  0x72   : > { %1091 = vmatmul.mubr.msk.bf16.vlgmr.msra.gmra.mxu0 %vm449_vm0, %v425_v5  ;;  %1099 = vmatmul.mubr.msk.bf16.vlgmr.msra.gmra.mxu1 %vm449_vm0, %v425_v5 }
  0x73   : > { %1103 = vmatpush3.bf16.msra.mxu0 %v1252_v6  ;;  %1106 = vmatprep.mubr.msk.bf16.mxu0 %vm1496_vm1, %v1495_v0 }
  0x74   : > { %1104 = vmatprep.subr.bf16.mxu0 %v1495_v0 }
  0x77   : > { %1105 = vmatpush3.bf16.msra.mxu0 %v1253_v7 }
  0x7a   : > { %1107 = vmatmul.mubr.msk.bf16.vlgmr.msra.gmra.mxu0 %vm449_vm0, %v602_v8 }
 0x132   : > { %v487_v11 = vpop.f32.mrf.mxu0  ;;  %v550_v13 = vpop.f32.mrf.mxu1 }
 0x133   : > { %v488_v12 = vadd.f32 %v1041_v9, %v487_v11  ;;  %v551_v14 = vadd.f32 %v1045_v10, %v550_v13 }
 0x134   : > { %v1092_v15 = vpop.f32.mrf.mxu0  ;;  %v1100_v17 = vpop.f32.mrf.mxu1 }
 0x135   : > { %v556_v16 = vpack.c.bf16 %v488_v12, %v488_v12  ;;  %v557_v18 = vpack.c.bf16 %v551_v14, %v551_v14 }
 0x136   : > { %v490_v19 = vpop.f32.mrf.mxu0  ;;  %v553_v20 = vpop.f32.mrf.mxu1 }
 0x137   : > { %559 = vst.msk [vmem:[#allocation3] sm:$0xf] %vm558_vm2, %v556_v16  ;;  %577 = vrot.lane.b32.xlu1 %v556_v16, %s1497_s17  ;;  %564 = vrot.lane.b32.xlu0 %v556_v16, %s1498_s27  ;;  %560 = vst.msk [vmem:[#allocation4] sm:$0xf] %vm558_vm2, %v557_v18 }
 0x138   : > { %v1093_v21 = vpop.f32.mrf.mxu0  ;;  %v1101_v23 = vpop.f32.mrf.mxu1 }
 0x13a   : > { %v664_v24 = vpop.f32.mrf.mxu0 }
 0x13b   : > { %v665_v25 = vadd.f32 %v1051_v22, %v664_v24  ;;  %582 = vrot.lane.b32.xlu1 %v557_v18, %s1497_s17  ;;  %572 = vrot.lane.b32.xlu0 %v557_v18, %s1498_s27 }
 0x13c   : > { %v1108_v26 = vpop.f32.mrf.mxu0 }
 0x13d   : > { %v670_v27 = vmul.f32 0.35355338, %v665_v25 }
 0x13e   : > { %v667_v28 = vpop.f32.mrf.mxu0 }
 0x13f   : > { %v671_v29 = vpack.c.bf16 %v670_v27, %v670_v27  ;;  %592 = vrot.lane.b32.xlu1 %v557_v18, %s1499_s26  ;;  %587 = vrot.lane.b32.xlu0 %v556_v16, %s1499_s26 }
 0x140   : > { %v1109_v30 = vpop.f32.mrf.mxu0 }
 0x141   : > { %673 = vst.msk [vmem:[#allocation2] sm:$0xf] %vm558_vm2, %v671_v29 }
 0x143   : > { %682 = vrot.lane.b32.xlu1 %v671_v29, %s1497_s17  ;;  %677 = vrot.lane.b32.xlu0 %v671_v29, %s1498_s27 }
 0x147   : > { %687 = vrot.lane.b32.xlu0 %v671_v29, %s1499_s26 }
 0x1a9   : > { %v578_v31 = vpop.permute.xlu1 %577  ;;  %v565_v32 = vpop.permute.xlu0 %564 }
 0x1aa   : > { %581 = vst.msk [vmem:[#allocation3 + $0x8] sm:$0xf] %vm558_vm2, %v578_v31  ;;  %568 = vst.msk [vmem:[#allocation3 + $0x4] sm:$0xf] %vm558_vm2, %v565_v32 }
 0x1ad   : > { %v583_v33 = vpop.permute.xlu1 %582  ;;  %v573_v34 = vpop.permute.xlu0 %572 }
 0x1ae   : > { %586 = vst.msk [vmem:[#allocation4 + $0x8] sm:$0xf] %vm558_vm2, %v583_v33  ;;  %576 = vst.msk [vmem:[#allocation4 + $0x4] sm:$0xf] %vm558_vm2, %v573_v34 }
 0x1b1   : > { %v593_v35 = vpop.permute.xlu1 %592  ;;  %v588_v36 = vpop.permute.xlu0 %587 }
 0x1b2   : > { %596 = vst.msk [vmem:[#allocation4 + $0xc] sm:$0xf] %vm558_vm2, %v593_v35  ;;  %591 = vst.msk [vmem:[#allocation3 + $0xc] sm:$0xf] %vm558_vm2, %v588_v36 }
 0x1b5   : > { %v683_v37 = vpop.permute.xlu1 %682  ;;  %v678_v38 = vpop.permute.xlu0 %677 }
 0x1b6   : > { %686 = vst.msk [vmem:[#allocation2 + $0x8] sm:$0xf] %vm558_vm2, %v683_v37  ;;  %681 = vst.msk [vmem:[#allocation2 + $0x4] sm:$0xf] %vm558_vm2, %v678_v38 }
 0x1b9   : > { %v688_v39 = vpop.permute.xlu0 %687 }
 0x1ba   : > { %691 = vst.msk [vmem:[#allocation2 + $0xc] sm:$0xf] %vm558_vm2, %v688_v39 }
 0x1bb LB: >> { %v1500_v40 = vmov 0.0   ;;  %vm1501_vm3 = vmmov 0   ;;  %s1765_s15 = sshll.u32 %s1486_s19, 2  ;;  %vm708_vm4 = vcmask 64512   ;;  %vm770_vm5 = vcmask 1043456   ;;  %v814_v3 = vld [vmem:[#allocation5] sm:$0xff]  ;;  %s1486_s19 = sphi %s1758_s19, %s698_s19  }
 0x1bc   : >> { %1110 = vmatprep.subr.bf16.mxu0 %v1500_v40  ;;  %1112 = vmatprep.mubr.msk.bf16.mxu0 %vm1501_vm3, %v1500_v40  ;;  %s703_s23 = scalar_lea.vmem [#allocation3], %s1765_s15  ;;  %s700_s25 = scalar_lea.vmem [#allocation2], %s1765_s15 }
 0x1bd   : >> { %1116 = vmatprep.subr.bf16.mxu1 %v1500_v40  ;;  %1118 = vmatprep.mubr.msk.bf16.mxu1 %vm1501_vm3, %v1500_v40  ;;  %v704_v41 = vld [vmem:[%s703_s23] sm:$0xf]  ;;  %s706_s18 = scalar_lea.vmem [#allocation4], %s1765_s15  ;;  %s817_s1 = scalar_lea.vmem [#allocation14], %s1765_s15 }
 0x1be   : >> { %v713_v42 = vsel %vm708_vm4, %v704_v41, 0  ;;  %v707_v54 = vld [vmem:[%s706_s18] sm:$0xf]  ;;  %s698_s19 = sadd.s32 1, %s1486_s19  }
 0x1bf   : >> { %1111 = vmatpush3.bf16.xpose.msra.mxu0 %v713_v42  ;;  %v772_v55 = vsel %vm770_vm5, %v707_v54, 0  ;;  %v818_v58 = vld [vmem:[%s817_s1] sm:$0xf]  ;;  %p695_p1 = scmp.ge.s32.totalorder %s698_s19, 4  }
 0x1c0   : >> { %1117 = vmatpush3.bf16.msra.mxu1 %v772_v55  ;;  %v823_v60 = vsel %vm770_vm5, %v818_v58, 0  ;;  %v1063_v10 = vld [vmem:[%s1843_s8] ss:$0 sm:$0xff] (%p695_p1)  ;;  %s1065_s13 = sshll.u32 (%p695_p1), %s1474_s12, 7  ;;  %s892_s24 = sshll.u32 (%p695_p1), %s1756_s20, 4  ;;  %s893_s24 = int_to_ptr.vmem [resolvable:$true] %s892_s24 }
 0x1c1   : >> { %v701_v43 = vld [vmem:[%s700_s25] sm:$0xf]  ;;  %1122 = vmatprep.subr.bf16.mxu1 %v1500_v40  ;;  %s1790_s27 = scalar_lea.hbm (%p695_p1), %s1844_s9, %s1065_s13  ;;  %s878_s21 = scalar_lea.sflag (%p695_p1), [#allocation8], %s1705_s3 }
 0x1c2   : > { %s1390_s26 = scalar_lea.vmem (%p695_p1), %s893_s24, 128  ;;  %s1502_s19 = smov (%p695_p1), [#allocation15]  }
 0x1c3   : > { %p1391_p3 = scmp.ne.s32.totalorder (%p695_p1), %s893_s24, %s1390_s26  ;;  %s1394_s15 = sshll.u32 (%p695_p1), %s1502_s19, 4  ;;  %s1395_s15 = int_to_ptr.vmem [resolvable:$false] %s1394_s15 }
 0x1c4   : > { %s1396_s12 = scalar_lea.vmem (%p695_p1), %s1395_s15, 256  ;;  %p1397_p8 = scmp.lt.s32.totalorder (%p695_p1), %s893_s24, %s1395_s15 }
 0x1c5   : > { %p1392_p5 = pnand (%p695_p1), %p1391_p3, %p1675_p2  ;;  %p1398_p7 = scmp.lt.s32.totalorder (%p695_p1), %s1396_s12, %s1390_s26 }
 0x1c6   : >> { %1113 = vmatmul.mubr.msk.bf16.vlgmr.msra.gmra.mxu0 %vm708_vm4, %v701_v43 }
 0x1c7   : > { %p1393_p0 = pneg (%p695_p1), %p1392_p5  ;;  %p1399_p9 = por (%p695_p1), %p1398_p7, %p1397_p8 }
 0x1c9   : > { %p1400_p10 = pnand (%p695_p1), %p1399_p9, %p1393_p0 }
 0x286   : >> { %v749_v44 = vpop.f32.mrf.mxu0 }
 0x287   : >> { %v755_v45 = vsel %vm708_vm4, %v749_v44, -inf }
 0x288   : >> { %756 = vmax.xlane.f32.xlu0 %v755_v45  ;;  %v1114_v46 = vpop.f32.mrf.mxu0 }
 0x28a   : >> { %v752_v47 = vpop.f32.mrf.mxu0 }
 0x28c   : >> { %v1115_v48 = vpop.f32.mrf.mxu0 }
 0x311   : >> { %v757_v49 = vpop.xlane.xlu0 %756 }
 0x312   : >> { %v758_v50 = vsub.f32 %v749_v44, %v757_v49 }
 0x314   : >> { %v759_v51 = vmul.f32 1.442695, %v758_v50 }
 0x316   : >> { %1254 = vpow2.f32 %v759_v51 }
 0x323   : >> { %v1255_v52 = vpop.eup %1254 }
 0x324   : >> { %v761_v53 = vsel %vm708_vm4, %v1255_v52, 0.0 }
 0x325   : >> { %762 = vadd.xlane.f32.xlu0 %v761_v53 }
 0x3ae   : >> { %v763_v56 = vpop.xlane.xlu0 %762 }
 0x3af   : >> { %1256 = vrcp.f32 %v763_v56 }
 0x3bc   : >> { %v1257_v57 = vpop.eup %1256 }
 0x3bd   : >> { %v765_v59 = vmul.f32 %v1257_v57, %v1255_v52 }
 0x3bf   : >> { %v766_v61 = vpack.c.bf16 %v765_v59, %v765_v59 }
 0x3c1   : >> { %1119 = vmatmul.mubr.msk.bf16.vlgmr.msra.gmra.mxu1 %vm708_vm4, %v766_v61 }
 0x3c2   : >> { %1123 = vmatpush3.bf16.msra.mxu1 %v823_v60  ;;  %1124 = vmatprep.mubr.msk.bf16.mxu1 %vm1501_vm3, %v1500_v40 }
 0x481   : >> { %v808_v62 = vpop.f32.mrf.mxu1 }
 0x482   : >> { %v815_v63 = vpack.c.bf16 %v808_v62, %v808_v62 }
 0x483   : >> { %v1120_v0 = vpop.f32.mrf.mxu1 }
 0x484   : >> { %1125 = vmatmul.mubr.msk.bf16.vlgmr.msra.gmra.mxu1 %vm708_vm4, %v815_v63 }
 0x485   : >> { %v811_v1 = vpop.f32.mrf.mxu1 }
 0x487   : >> { %v1121_v2 = vpop.f32.mrf.mxu1 }
 0x544   : >> { %v859_v4 = vpop.f32.mrf.mxu1 }
 0x545   : >> { %v865_v5 = vadd.f32 %v859_v4, %v814_v3 }
 0x546   : >> { %v1126_v6 = vpop.f32.mrf.mxu1 }
 0x547   : >> { %866 = vst.msk [vmem:[#allocation5] sm:$0xff] %vm449_vm0, %v865_v5 }
 0x548   : >> { %v862_v7 = vpop.f32.mrf.mxu1 }
 0x54a   : >> { %v1127_v8 = vpop.f32.mrf.mxu1 }
 0x54c   : > { %697 = sbr.rel (!%p695_p1) target bundleno = 443 (0x1bb), region = 142 }
 0x54e   : > { %v867_v9 = vld [vmem:[#allocation5] sm:$0xff] (%p695_p1) }
 0x54f   : > { %v875_v11 = vadd.f32 (%p695_p1), %v1063_v10, %v867_v9 }
 0x551   : > { %876 = vst.msk [vmem:[%s1756_s20] sm:$0xff] %vm449_vm0, %v875_v11 }
 0x552   : > { %1403 = shalt.err (!%p1400_p10)
}
 0x553   : > { %s1404_s20 = scalar_lea.hbm %s1790_s27, 128  ;;  %s1408_s25 = scalar_lea.hbm %s1844_s9, 256 }
 0x554   : > { %p1405_p12 = scmp.ne.s32.totalorder %s1790_s27, %s1404_s20  ;;  %p1409_p4 = scmp.lt.s32.totalorder %s1790_s27, %s1844_s9 }
 0x555   : > { %p1410_p11 = scmp.lt.s32.totalorder %s1408_s25, %s1404_s20 }
 0x556   : > { %p1406_p6 = pnand %p1405_p12, %p1675_p2 }
 0x557   : > { %p1411_p1 = por %p1410_p11, %p1409_p4 }
 0x558   : > { %p1407_p13 = pneg %p1406_p6 }
 0x55a   : > { %p1412_p3 = pnand %p1411_p1, %p1407_p13 }
 0x55c   : > { %1415 = shalt.err (!%p1412_p3)
}
 0x55d   : > { %1146 = dma.vmem_to_hbm [thread:$0]  (%p1675_p2), %s893_s24, 128, %s1790_s27, %s878_s21  }
 0x55e PF: > { %s904_s5 = sand.u32 1, %s1462_s30   ;;  %p1865_p5 = scmp.ne.s32.totalorder %s1863_s29, 0 }
 0x55f   : > { %p1866_p0 = scmp.ge.s32.totalorder %s1482_s14, 2  ;;  %s905_s7 = scalar_lea.sflag [#allocation8], %s904_s5 }
 0x561   : > { %p1166_p8 = pnand %p1866_p0, %p1865_p5 }
 0x563   : > { %p1167_p7 = pneg %p1166_p8 }
 0x565   : > { %1457 = dma.done.wait (%p1167_p7), %s905_s7, 128  }
 0x566   : > { %1459 = vsyncadd (%p1167_p7), %s905_s7, 4294967168  ;;  %s27_s14 = sadd.s32 1, %s1482_s14   ;;  %s1867_s12 = sld [smem:[#allocation20_spill]] }
 0x567   : > { %p24_p9 = scmp.ge.s32.totalorder %s27_s14, 4   ;;  %s1868_s13 = sld [smem:[#allocation21_spill]] }
 0x568   : > { %s1869_s30 = smov %s1466_s10  ;;  %s1870_s10 = smov %s1470_s11 }
 0x569   : > { %s1871_s11 = smov %s1680_s22  ;;  %26 = sbr.rel (!%p24_p9) target bundleno = 13 (0xd), region = 153 }
 0x56e   :  { %910 = vsyncpa [#allocation7], 1 }
 0x56f   :  { %912 = vsyncpa [#allocation7 + $0x1], 1 }
 0x570   :  { %913 = vsyncpa [#allocation10], 1 }
 0x571   :  { %914 = vsyncpa [#allocation13], 1 }
 0x572   :  { %915 = vsyncpa [#allocation8], 1 }
 0x573   :  { %917 = vsyncpa [#allocation8 + $0x1], 1 }

// kernel: tpu_custom_call.1
= control target key start
LH: loop header
LB: loop body
LE: loop exit
PB: predicated region body
PF: predicated region fallthrough
CT: control target
= control target key end

     0   :  { %s1835_s0 = inlined_call_operand.hbm [shape: bf16[2,8,32], index: 0, kind: input, shape index: {}]   ;;  %s1836_s1 = inlined_call_operand.hbm [shape: bf16[32,32], index: 1, kind: input, shape index: {}]   ;;  %s1837_s2 = inlined_call_operand.vmem [shape: f32[1,32], index: 2, kind: input, shape index: {}]   ;;  %s1838_s3 = inlined_call_operand.hbm [shape: bf16[32,32], index: 3, kind: input, shape index: {}]   ;;  %s1839_s4 = inlined_call_operand.vmem [shape: f32[1,32], index: 4, kind: input, shape index: {}]   ;;  %s1840_s5 = inlined_call_operand.hbm [shape: bf16[32,32], index: 5, kind: input, shape index: {}]   ;;  %s1841_s6 = inlined_call_operand.vmem [shape: f32[1,32], index: 6, kind: input, shape index: {}]   ;;  %s1842_s7 = inlined_call_operand.hbm [shape: bf16[4,8,32], index: 7, kind: input, shape index: {}]   ;;  %s1843_s8 = inlined_call_operand.vmem [shape: f32[1,32], index: 8, kind: input, shape index: {}]   ;;  %s1844_s9 = inlined_call_operand.hbm [shape: f32[2,8,32], index: 9, kind: output, shape index: {}]  }
   0x1   :  { %1847 = sst [smem:[#allocation22_spill]] %s1836_s1 }
   0x2   :  { %1848 = sst [smem:[#allocation23_spill]] %s1838_s3 }
   0x3   :  { %1849 = sst [smem:[#allocation24_spill]] %s1840_s5 }
   0x4   :  { %1850 = sst [smem:[#allocation25_spill]] %s1842_s7 }
   0x5   :  { %14 = vsyncpa [#allocation7], 0 }
   0x6   :  { %16 = vsyncpa [#allocation7 + $0x1], 0 }
   0x7   :  { %17 = vsyncpa [#allocation10], 0 }
   0x8   :  { %18 = vsyncpa [#allocation13], 0 }
   0x9   :  { %19 = vsyncpa [#allocation8], 0 }
   0xa   :  { %21 = vsyncpa [#allocation8 + $0x1], 0  ;;  %s1553_s30 = smov 0   ;;  %s1555_s10 = smov 0  }
   0xb   :  { %s1557_s11 = smov 0   ;;  %s1559_s12 = smov 0  }
   0xc   :  { %s1561_s13 = smov 0   ;;  %s1563_s14 = smov 0  }
   0xd LB: > { %1851 = sst [smem:[#allocation20_spill]] %s1478_s13  ;;  %s1024_s15 = sadd.s32 4294967295, %s1482_s14   ;;  %s1482_s14 = sphi %s1563_s14, %s27_s14   ;;  %s1478_s13 = sphi %s1561_s13, %s1868_s13   ;;  %s1474_s12 = sphi %s1559_s12, %s1867_s12   ;;  %s1470_s11 = sphi %s1557_s11, %s1871_s11   ;;  %s1466_s10 = sphi %s1555_s10, %s1870_s10   ;;  %s1462_s30 = sphi %s1553_s30, %s1869_s30  }
   0xe   : > { %p1026_p0 = scmp.ge.s32.totalorder %s1482_s14, 1  ;;  %p1587_p1 = scmp.eq.s32.totalorder %s1024_s15, 0 }
   0xf   : > { %p266_p2 = scmp.lt.s32.totalorder %s1482_s14, 3  ;;  %s1488_s18 = smov [#allocation9]  }
  0x10   : > { %s278_s19 = sshll.u32 %s1488_s18, 4  ;;  %s1489_s21 = smov [#allocation12]   ;;  %s279_s19 = int_to_ptr.vmem [resolvable:$true] %s278_s19 }
  0x11   : > { %p1592_p3 = pnand %p1026_p0, %p266_p2  ;;  %s310_s22 = sshll.u32 %s1489_s21, 4  ;;  %s311_s22 = int_to_ptr.vmem [resolvable:$true] %s310_s22 }
  0x12   : > { %s1490_s23 = smov [#allocation11]   ;;  %s1269_s25 = scalar_lea.vmem %s279_s19, 256 }
  0x13   : > { %p1148_p4 = pneg %p1592_p3  ;;  %s294_s24 = sshll.u32 %s1490_s23, 4  ;;  %s295_s24 = int_to_ptr.vmem [resolvable:$true] %s294_s24 }
  0x14   : > { %p1270_p8 = scmp.ne.s32.totalorder %s279_s19, %s1269_s25  ;;  %p1277_p11 = scmp.lt.s32.totalorder %s279_s19, %s279_s19 }
  0x15   : > { %p1601_p6 = pnand %p1148_p4, %p1587_p1  ;;  %p1278_p12 = scmp.lt.s32.totalorder %s1269_s25, %s1269_s25 }
  0x17   : > { %p1260_p7 = pneg %p1601_p6  ;;  %p1279_p13 = por %p1278_p12, %p1277_p11 }
  0x19   : > { %p1272_p9 = pnand %p1270_p8, %p1260_p7 }
  0x1b   : > { %p1273_p10 = pneg %p1272_p9 }
  0x1d   : > { %p1280_p0 = pnand %p1279_p13, %p1273_p10 }
  0x1f   : > { %1283 = shalt.err (!%p1280_p0)
}
  0x20   : > { %s1491_s26 = smov 64   ;;  %s1492_s27 = smov 4  }
  0x21   : > { %s1855_s1 = sld [smem:[#allocation22_spill]]  ;;  %s1295_s18 = scalar_lea.vmem %s311_s22, 256 }
  0x22   : > { %p1296_p2 = scmp.ne.s32.totalorder %s311_s22, %s1295_s18  ;;  %p1303_p9 = scmp.lt.s32.totalorder %s311_s22, %s311_s22 }
  0x23   : > { %p1304_p10 = scmp.lt.s32.totalorder %s1295_s18, %s1295_s18 }
  0x24   : > { %p1298_p4 = pnand %p1296_p2, %p1260_p7 }
  0x25   : > { %p1305_p11 = por %p1304_p10, %p1303_p9 }
  0x26   : > { %p1299_p8 = pneg %p1298_p4 }
  0x27   : > { %1151 = dma.hbm_to_vmem [thread:$0]  (!%p1601_p6), %s1855_s1, 256, %s279_s19, [#allocation10], %s1491_s26, %s1491_s26, %s1492_s27  }
  0x28   : > { %p1306_p12 = pnand %p1305_p11, %p1299_p8 }
  0x2a   : > { %1309 = shalt.err (!%p1306_p12)
}
  0x2b   : > { %s1856_s5 = sld [smem:[#allocation24_spill]]  ;;  %s1321_s19 = scalar_lea.vmem %s295_s24, 256 }
  0x2c   : > { %p1322_p13 = scmp.ne.s32.totalorder %s295_s24, %s1321_s19  ;;  %p1329_p4 = scmp.lt.s32.totalorder %s295_s24, %s295_s24 }
  0x2d   : > { %p1330_p8 = scmp.lt.s32.totalorder %s1321_s19, %s1321_s19 }
  0x2e   : > { %p1324_p0 = pnand %p1322_p13, %p1260_p7 }
  0x2f   : > { %p1331_p9 = por %p1330_p8, %p1329_p4 }
  0x30   : > { %p1325_p2 = pneg %p1324_p0 }
  0x31   : > { %1157 = dma.hbm_to_vmem [thread:$0]  (!%p1601_p6), %s1856_s5, 256, %s311_s22, [#allocation13], %s1491_s26, %s1491_s26, %s1492_s27  }
  0x32   : > { %p1332_p10 = pnand %p1331_p9, %p1325_p2 }
  0x34   : > { %1335 = shalt.err (!%p1332_p10)
}
  0x35   : > { %s1857_s3 = sld [smem:[#allocation23_spill]]  ;;  %s1493_s22 = smov [#allocation14]  }
  0x36   : > { %s326_s29 = sshll.u32 %s1493_s22, 4  ;;  %s327_s29 = int_to_ptr.vmem [resolvable:$true] %s326_s29 }
  0x37   : > { %s1347_s18 = scalar_lea.vmem %s327_s29, 256  ;;  %p1355_p0 = scmp.lt.s32.totalorder %s327_s29, %s327_s29 }
  0x38   : > { %p1348_p11 = scmp.ne.s32.totalorder %s327_s29, %s1347_s18  ;;  %p1356_p2 = scmp.lt.s32.totalorder %s1347_s18, %s1347_s18 }
  0x3a   : > { %p1350_p12 = pnand %p1348_p11, %p1260_p7  ;;  %p1357_p4 = por %p1356_p2, %p1355_p0 }
  0x3b   : > { %1154 = dma.hbm_to_vmem [thread:$0]  (!%p1601_p6), %s1857_s3, 256, %s295_s24, [#allocation10], %s1491_s26, %s1491_s26, %s1492_s27  }
  0x3c   : > { %p1351_p13 = pneg %p1350_p12 }
  0x3e   : > { %p1358_p8 = pnand %p1357_p4, %p1351_p13 }
  0x40   : > { %1361 = shalt.err (!%p1358_p8)
}
  0x41   : > { %s1858_s7 = sld [smem:[#allocation25_spill]]  ;;  %s1025_s20 = sadd.s32 4294967294, %s1482_s14  }
  0x42   : > { %s39_s23 = sadd.s32 1, %s1478_s13  ;;  %s46_s19 = sadd.s32 1, %s1470_s11 }
  0x43   : > { %p41_p7 = scmp.ge.s32.totalorder %s39_s23, 2  ;;  %p53_p9 = scmp.ne.s32.totalorder %s1470_s11, %s1466_s10 }
  0x44   : > { %p54_p10 = scmp.eq.s32.totalorder %s1482_s14, 0  ;;  %p59_p12 = scmp.ne.s32.totalorder %s1466_s10, %s1462_s30 }
  0x45   : > { %s1873_s23 = smov (%p41_p7, %s39_s23), 0  ;;  %p259_p4 = scmp.eq.s32.totalorder %s1025_s20, 1 }
  0x46   : > { %1859 = sst [smem:[#allocation21_spill]] %s1873_s23  ;;  %p1659_p11 = por %p54_p10, %p53_p9 }
  0x47   : > { %1160 = dma.hbm_to_vmem [thread:$0]  (!%p1601_p6), %s1858_s7, 256, %s327_s29, [#allocation13], %s1491_s26, %s1491_s26, %s1492_s27  }
  0x48   : > { %s43_s26 = ssub.s32 %s1478_s13, %s1873_s23  ;;  %p253_p6 = scmp.eq.s32.totalorder %s1024_s15, 1 }
  0x49   : > { %p44_p13 = scmp.eq.s32.totalorder %s43_s26, 0  ;;  %p1671_p0 = por %p1587_p1, %p59_p12 }
  0x4a   : > { %p1675_p2 = por %p253_p6, %p53_p9  ;;  %p1682_p8 = por %p259_p4, %p59_p12 }
  0x4b   : > { %s1680_s22 = scalar_select %p44_p13, %s1470_s11, %s46_s19  }
  0x4c   : > { %s1863_s29 = scalar_select %p1682_p8, 1, 0 }
  0x4d   : > { %p1173_p7 = scmp.lt.s32.totalorder %s1482_s14, 2  ;;  %s343_s18 = sand.u32 1, %s1470_s11  }
  0x4e   : > { %s1033_s15 = sshll.u32 %s1478_s13, 6  ;;  %s1032_s24 = sshll.u32 %s343_s18, 2 }
  0x4f   : > { %s352_s1 = scalar_lea.hbm %s1835_s0, %s1033_s15  ;;  %s347_s3 = scalar_lea.vmem [#allocation6], %s1032_s24 }
  0x50   : > { %s354_s5 = sshll.u32 %s347_s3, 4  ;;  %p1694_p9 = pnand %p1173_p7, %p1659_p11  ;;  %s355_s5 = int_to_ptr.vmem [resolvable:$true] %s354_s5 }
  0x51   : > { %s344_s20 = scalar_lea.sflag [#allocation7], %s343_s18  ;;  %s1375_s19 = scalar_lea.vmem %s355_s5, 64 }
  0x52   : > { %p1364_p10 = pneg %p1694_p9  ;;  %p1376_p12 = scmp.ne.s32.totalorder %s355_s5, %s1375_s19 }
  0x53   : > { %s1494_s23 = smov [#allocation6]  }
  0x54   : > { %p1378_p6 = pnand %p1376_p12, %p1364_p10  ;;  %s1380_s13 = sshll.u32 %s1494_s23, 4  ;;  %s1381_s13 = int_to_ptr.vmem [resolvable:$false] %s1380_s13 }
  0x55   : > { %s1382_s15 = scalar_lea.vmem %s1381_s13, 128  ;;  %p1383_p4 = scmp.lt.s32.totalorder %s355_s5, %s1381_s13 }
  0x56   : > { %p1379_p13 = pneg %p1378_p6  ;;  %p1384_p5 = scmp.lt.s32.totalorder %s1382_s15, %s1375_s19 }
  0x58   : > { %p1385_p8 = por %p1384_p5, %p1383_p4 }
  0x5a   : > { %p1386_p11 = pnand %p1385_p8, %p1379_p13 }
  0x5c   : > { %1389 = shalt.err (!%p1386_p11)
}
  0x5d   : > { %1164 = dma.hbm_to_vmem [thread:$0]  (!%p1694_p9), %s352_s1, 64, %s355_s5, %s344_s20  }
  0x5e   : > { %363 = sbr.rel (%p1592_p3) target bundleno = 1374 (0x55e), region = 56  ;;  %s1705_s3 = sand.u32 (!%p1592_p3), 1, %s1466_s10  }
  0x5f   : > { %s1035_s23 = sshll.u32 (!%p1592_p3), %s1705_s3, 2  ;;  %s366_s25 = scalar_lea.sflag (!%p1592_p3), [#allocation7], %s1705_s3 }
  0x60   : > { %s1709_s18 = scalar_lea.vmem (!%p1592_p3), [#allocation6], %s1035_s23 }
  0x63   : > { %1445 = dma.done.wait (%p1671_p0), %s366_s25, 64  }
  0x64   : > { %1447 = vsyncadd (%p1671_p0), %s366_s25, 4294967232 }
  0x65   : > { %1449 = dma.done.wait (%p1587_p1), [#allocation10], 512  }
  0x66   : > { %1451 = vsyncadd (%p1587_p1), [#allocation10], 4294966784 }
  0x67   : > { %1453 = dma.done.wait (%p1587_p1), [#allocation13], 512  }
  0x68   : > { %1455 = vsyncadd (%p1587_p1), [#allocation13], 4294966784  ;;  %s1040_s1 = sshll.u32 %s1705_s3, 3  ;;  %vm449_vm0 = vcmask 261120   ;;  %v1495_v0 = vmov 0.0   ;;  %vm1496_vm1 = vmmov 0  }
  0x69   : > { %1086 = vmatprep.subr.bf16.mxu0 %v1495_v0  ;;  %1094 = vmatprep.subr.bf16.mxu1 %v1495_v0  ;;  %692 = vst.msk [vmem:[#allocation5] sm:$0xff] %vm449_vm0, %v1495_v0  ;;  %v1248_v1 = vld [vmem:[#allocation11 + $0x8] sm:$0xff]   ;;  %v1249_v2 = vld [vmem:[#allocation12 + $0x8] sm:$0xff]   ;;  %v1250_v3 = vld [vmem:[#allocation11] sm:$0xff]   ;;  %vm558_vm2 = vcmask 60416   ;;  %s1497_s17 = smov 112  }
  0x6a   : > { %1090 = vmatprep.mubr.msk.bf16.mxu0 %vm1496_vm1, %v1495_v0  ;;  %1098 = vmatprep.mubr.msk.bf16.mxu1 %vm1496_vm1, %v1495_v0  ;;  %v1251_v4 = vld [vmem:[#allocation12] sm:$0xff]   ;;  %v425_v5 = vld [vmem:[%s1709_s18] sm:$0xf]  ;;  %v1252_v6 = vld [vmem:[#allocation9 + $0x8] sm:$0xff]   ;;  %s1498_s27 = smov 120   ;;  %s1499_s26 = smov 104  }
  0x6b   : > { %1087 = vmatpush3.bf16.msra.mxu0 %v1248_v1  ;;  %1095 = vmatpush3.bf16.msra.mxu1 %v1249_v2  ;;  %v1253_v7 = vld [vmem:[#allocation9] sm:$0xff]   ;;  %v602_v8 = vld [vmem:[%s1709_s18] sm:$0xf]  ;;  %s1756_s20 = scalar_lea.vmem [#allocation15], %s1040_s1  ;;  %s1758_s19 = smov 0  }
  0x6c   : > { %1088 = vmatprep.subr.bf16.mxu0 %v1495_v0  ;;  %1096 = vmatprep.subr.bf16.mxu1 %v1495_v0  ;;  %v1041_v9 = vld [vmem:[%s1839_s4] ss:$0 sm:$0xff] }
  0x6d   : > { %v1045_v10 = vld [vmem:[%s1841_s6] ss:$0 sm:$0xff] }
  0x6e   : > { %v1051_v22 = vld [vmem:[%s1837_s2] ss:$0 sm:$0xff] }
  0x6f   : > { %1089 = vmatpush3.bf16.msra.mxu0 %v1250_v3  ;;  %1097 = vmatpush3.bf16.msra.mxu1 %v1251_v4 }
  0x70   : > { %1102 = vmatprep.subr.bf16.mxu0 %v1495_v0 }
  0x72   : > { %1091 = vmatmul.mubr.msk.bf16.vlgmr.msra.gmra.mxu0 %vm449_vm0, %v425_v5  ;;  %1099 = vmatmul.mubr.msk.bf16.vlgmr.msra.gmra.mxu1 %vm449_vm0, %v425_v5 }
  0x73   : > { %1103 = vmatpush3.bf16.msra.mxu0 %v1252_v6  ;;  %1106 = vmatprep.mubr.msk.bf16.mxu0 %vm1496_vm1, %v1495_v0 }
  0x74   : > { %1104 = vmatprep.subr.bf16.mxu0 %v1495_v0 }
  0x77   : > { %1105 = vmatpush3.bf16.msra.mxu0 %v1253_v7 }
  0x7a   : > { %1107 = vmatmul.mubr.msk.bf16.vlgmr.msra.gmra.mxu0 %vm449_vm0, %v602_v8 }
 0x132   : > { %v487_v11 = vpop.f32.mrf.mxu0  ;;  %v550_v13 = vpop.f32.mrf.mxu1 }
 0x133   : > { %v488_v12 = vadd.f32 %v1041_v9, %v487_v11  ;;  %v551_v14 = vadd.f32 %v1045_v10, %v550_v13 }
 0x134   : > { %v1092_v15 = vpop.f32.mrf.mxu0  ;;  %v1100_v17 = vpop.f32.mrf.mxu1 }
 0x135   : > { %v556_v16 = vpack.c.bf16 %v488_v12, %v488_v12  ;;  %v557_v18 = vpack.c.bf16 %v551_v14, %v551_v14 }
 0x136   : > { %v490_v19 = vpop.f32.mrf.mxu0  ;;  %v553_v20 = vpop.f32.mrf.mxu1 }
 0x137   : > { %559 = vst.msk [vmem:[#allocation3] sm:$0xf] %vm558_vm2, %v556_v16  ;;  %577 = vrot.lane.b32.xlu1 %v556_v16, %s1497_s17  ;;  %564 = vrot.lane.b32.xlu0 %v556_v16, %s1498_s27  ;;  %560 = vst.msk [vmem:[#allocation4] sm:$0xf] %vm558_vm2, %v557_v18 }
 0x138   : > { %v1093_v21 = vpop.f32.mrf.mxu0  ;;  %v1101_v23 = vpop.f32.mrf.mxu1 }
 0x13a   : > { %v664_v24 = vpop.f32.mrf.mxu0 }
 0x13b   : > { %v665_v25 = vadd.f32 %v1051_v22, %v664_v24  ;;  %582 = vrot.lane.b32.xlu1 %v557_v18, %s1497_s17  ;;  %572 = vrot.lane.b32.xlu0 %v557_v18, %s1498_s27 }
 0x13c   : > { %v1108_v26 = vpop.f32.mrf.mxu0 }
 0x13d   : > { %v670_v27 = vmul.f32 0.35355338, %v665_v25 }
 0x13e   : > { %v667_v28 = vpop.f32.mrf.mxu0 }
 0x13f   : > { %v671_v29 = vpack.c.bf16 %v670_v27, %v670_v27  ;;  %592 = vrot.lane.b32.xlu1 %v557_v18, %s1499_s26  ;;  %587 = vrot.lane.b32.xlu0 %v556_v16, %s1499_s26 }
 0x140   : > { %v1109_v30 = vpop.f32.mrf.mxu0 }
 0x141   : > { %673 = vst.msk [vmem:[#allocation2] sm:$0xf] %vm558_vm2, %v671_v29 }
 0x143   : > { %682 = vrot.lane.b32.xlu1 %v671_v29, %s1497_s17  ;;  %677 = vrot.lane.b32.xlu0 %v671_v29, %s1498_s27 }
 0x147   : > { %687 = vrot.lane.b32.xlu0 %v671_v29, %s1499_s26 }
 0x1a9   : > { %v578_v31 = vpop.permute.xlu1 %577  ;;  %v565_v32 = vpop.permute.xlu0 %564 }
 0x1aa   : > { %581 = vst.msk [vmem:[#allocation3 + $0x8] sm:$0xf] %vm558_vm2, %v578_v31  ;;  %568 = vst.msk [vmem:[#allocation3 + $0x4] sm:$0xf] %vm558_vm2, %v565_v32 }
 0x1ad   : > { %v583_v33 = vpop.permute.xlu1 %582  ;;  %v573_v34 = vpop.permute.xlu0 %572 }
 0x1ae   : > { %586 = vst.msk [vmem:[#allocation4 + $0x8] sm:$0xf] %vm558_vm2, %v583_v33  ;;  %576 = vst.msk [vmem:[#allocation4 + $0x4] sm:$0xf] %vm558_vm2, %v573_v34 }
 0x1b1   : > { %v593_v35 = vpop.permute.xlu1 %592  ;;  %v588_v36 = vpop.permute.xlu0 %587 }
 0x1b2   : > { %596 = vst.msk [vmem:[#allocation4 + $0xc] sm:$0xf] %vm558_vm2, %v593_v35  ;;  %591 = vst.msk [vmem:[#allocation3 + $0xc] sm:$0xf] %vm558_vm2, %v588_v36 }
 0x1b5   : > { %v683_v37 = vpop.permute.xlu1 %682  ;;  %v678_v38 = vpop.permute.xlu0 %677 }
 0x1b6   : > { %686 = vst.msk [vmem:[#allocation2 + $0x8] sm:$0xf] %vm558_vm2, %v683_v37  ;;  %681 = vst.msk [vmem:[#allocation2 + $0x4] sm:$0xf] %vm558_vm2, %v678_v38 }
 0x1b9   : > { %v688_v39 = vpop.permute.xlu0 %687 }
 0x1ba   : > { %691 = vst.msk [vmem:[#allocation2 + $0xc] sm:$0xf] %vm558_vm2, %v688_v39 }
 0x1bb LB: >> { %v1500_v40 = vmov 0.0   ;;  %vm1501_vm3 = vmmov 0   ;;  %s1765_s15 = sshll.u32 %s1486_s19, 2  ;;  %vm708_vm4 = vcmask 64512   ;;  %vm770_vm5 = vcmask 1043456   ;;  %v814_v3 = vld [vmem:[#allocation5] sm:$0xff]  ;;  %s1486_s19 = sphi %s1758_s19, %s698_s19  }
 0x1bc   : >> { %1110 = vmatprep.subr.bf16.mxu0 %v1500_v40  ;;  %1112 = vmatprep.mubr.msk.bf16.mxu0 %vm1501_vm3, %v1500_v40  ;;  %s703_s23 = scalar_lea.vmem [#allocation3], %s1765_s15  ;;  %s700_s25 = scalar_lea.vmem [#allocation2], %s1765_s15 }
 0x1bd   : >> { %1116 = vmatprep.subr.bf16.mxu1 %v1500_v40  ;;  %1118 = vmatprep.mubr.msk.bf16.mxu1 %vm1501_vm3, %v1500_v40  ;;  %v704_v41 = vld [vmem:[%s703_s23] sm:$0xf]  ;;  %s706_s18 = scalar_lea.vmem [#allocation4], %s1765_s15  ;;  %s817_s1 = scalar_lea.vmem [#allocation14], %s1765_s15 }
 0x1be   : >> { %v713_v42 = vsel %vm708_vm4, %v704_v41, 0  ;;  %v707_v54 = vld [vmem:[%s706_s18] sm:$0xf]  ;;  %s698_s19 = sadd.s32 1, %s1486_s19  }
 0x1bf   : >> { %1111 = vmatpush3.bf16.xpose.msra.mxu0 %v713_v42  ;;  %v772_v55 = vsel %vm770_vm5, %v707_v54, 0  ;;  %v818_v58 = vld [vmem:[%s817_s1] sm:$0xf]  ;;  %p695_p1 = scmp.ge.s32.totalorder %s698_s19, 4  }
 0x1c0   : >> { %1117 = vmatpush3.bf16.msra.mxu1 %v772_v55  ;;  %v823_v60 = vsel %vm770_vm5, %v818_v58, 0  ;;  %v1063_v10 = vld [vmem:[%s1843_s8] ss:$0 sm:$0xff] (%p695_p1)  ;;  %s1065_s13 = sshll.u32 (%p695_p1), %s1474_s12, 7  ;;  %s892_s24 = sshll.u32 (%p695_p1), %s1756_s20, 4  ;;  %s893_s24 = int_to_ptr.vmem [resolvable:$true] %s892_s24 }
 0x1c1   : >> { %v701_v43 = vld [vmem:[%s700_s25] sm:$0xf]  ;;  %1122 = vmatprep.subr.bf16.mxu1 %v1500_v40  ;;  %s1790_s27 = scalar_lea.hbm (%p695_p1), %s1844_s9, %s1065_s13  ;;  %s878_s21 = scalar_lea.sflag (%p695_p1), [#allocation8], %s1705_s3 }
 0x1c2   : > { %s1390_s26 = scalar_lea.vmem (%p695_p1), %s893_s24, 128  ;;  %s1502_s19 = smov (%p695_p1), [#allocation15]  }
 0x1c3   : > { %p1391_p3 = scmp.ne.s32.totalorder (%p695_p1), %s893_s24, %s1390_s26  ;;  %s1394_s15 = sshll.u32 (%p695_p1), %s1502_s19, 4  ;;  %s1395_s15 = int_to_ptr.vmem [resolvable:$false] %s1394_s15 }
 0x1c4   : > { %s1396_s12 = scalar_lea.vmem (%p695_p1), %s1395_s15, 256  ;;  %p1397_p8 = scmp.lt.s32.totalorder (%p695_p1), %s893_s24, %s1395_s15 }
 0x1c5   : > { %p1392_p5 = pnand (%p695_p1), %p1391_p3, %p1675_p2  ;;  %p1398_p7 = scmp.lt.s32.totalorder (%p695_p1), %s1396_s12, %s1390_s26 }
 0x1c6   : >> { %1113 = vmatmul.mubr.msk.bf16.vlgmr.msra.gmra.mxu0 %vm708_vm4, %v701_v43 }
 0x1c7   : > { %p1393_p0 = pneg (%p695_p1), %p1392_p5  ;;  %p1399_p9 = por (%p695_p1), %p1398_p7, %p1397_p8 }
 0x1c9   : > { %p1400_p10 = pnand (%p695_p1), %p1399_p9, %p1393_p0 }
 0x286   : >> { %v749_v44 = vpop.f32.mrf.mxu0 }
 0x287   : >> { %v755_v45 = vsel %vm708_vm4, %v749_v44, -inf }
 0x288   : >> { %756 = vmax.xlane.f32.xlu0 %v755_v45  ;;  %v1114_v46 = vpop.f32.mrf.mxu0 }
 0x28a   : >> { %v752_v47 = vpop.f32.mrf.mxu0 }
 0x28c   : >> { %v1115_v48 = vpop.f32.mrf.mxu0 }
 0x311   : >> { %v757_v49 = vpop.xlane.xlu0 %756 }
 0x312   : >> { %v758_v50 = vsub.f32 %v749_v44, %v757_v49 }
 0x314   : >> { %v759_v51 = vmul.f32 1.442695, %v758_v50 }
 0x316   : >> { %1254 = vpow2.f32 %v759_v51 }
 0x323   : >> { %v1255_v52 = vpop.eup %1254 }
 0x324   : >> { %v761_v53 = vsel %vm708_vm4, %v1255_v52, 0.0 }
 0x325   : >> { %762 = vadd.xlane.f32.xlu0 %v761_v53 }
 0x3ae   : >> { %v763_v56 = vpop.xlane.xlu0 %762 }
 0x3af   : >> { %1256 = vrcp.f32 %v763_v56 }
 0x3bc   : >> { %v1257_v57 = vpop.eup %1256 }
 0x3bd   : >> { %v765_v59 = vmul.f32 %v1257_v57, %v1255_v52 }
 0x3bf   : >> { %v766_v61 = vpack.c.bf16 %v765_v59, %v765_v59 }
 0x3c1   : >> { %1119 = vmatmul.mubr.msk.bf16.vlgmr.msra.gmra.mxu1 %vm708_vm4, %v766_v61 }
 0x3c2   : >> { %1123 = vmatpush3.bf16.msra.mxu1 %v823_v60  ;;  %1124 = vmatprep.mubr.msk.bf16.mxu1 %vm1501_vm3, %v1500_v40 }
 0x481   : >> { %v808_v62 = vpop.f32.mrf.mxu1 }
 0x482   : >> { %v815_v63 = vpack.c.bf16 %v808_v62, %v808_v62 }
 0x483   : >> { %v1120_v0 = vpop.f32.mrf.mxu1 }
 0x484   : >> { %1125 = vmatmul.mubr.msk.bf16.vlgmr.msra.gmra.mxu1 %vm708_vm4, %v815_v63 }
 0x485   : >> { %v811_v1 = vpop.f32.mrf.mxu1 }
 0x487   : >> { %v1121_v2 = vpop.f32.mrf.mxu1 }
 0x544   : >> { %v859_v4 = vpop.f32.mrf.mxu1 }
 0x545   : >> { %v865_v5 = vadd.f32 %v859_v4, %v814_v3 }
 0x546   : >> { %v1126_v6 = vpop.f32.mrf.mxu1 }
 0x547   : >> { %866 = vst.msk [vmem:[#allocation5] sm:$0xff] %vm449_vm0, %v865_v5 }
 0x548   : >> { %v862_v7 = vpop.f32.mrf.mxu1 }
 0x54a   : >> { %v1127_v8 = vpop.f32.mrf.mxu1 }
 0x54c   : > { %697 = sbr.rel (!%p695_p1) target bundleno = 443 (0x1bb), region = 142 }
 0x54e   : > { %v867_v9 = vld [vmem:[#allocation5] sm:$0xff] (%p695_p1) }
 0x54f   : > { %v875_v11 = vadd.f32 (%p695_p1), %v1063_v10, %v867_v9 }
 0x551   : > { %876 = vst.msk [vmem:[%s1756_s20] sm:$0xff] %vm449_vm0, %v875_v11 }
 0x552   : > { %1403 = shalt.err (!%p1400_p10)
}
 0x553   : > { %s1404_s20 = scalar_lea.hbm %s1790_s27, 128  ;;  %s1408_s25 = scalar_lea.hbm %s1844_s9, 256 }
 0x554   : > { %p1405_p12 = scmp.ne.s32.totalorder %s1790_s27, %s1404_s20  ;;  %p1409_p4 = scmp.lt.s32.totalorder %s1790_s27, %s1844_s9 }
 0x555   : > { %p1410_p11 = scmp.lt.s32.totalorder %s1408_s25, %s1404_s20 }
 0x556   : > { %p1406_p6 = pnand %p1405_p12, %p1675_p2 }
 0x557   : > { %p1411_p1 = por %p1410_p11, %p1409_p4 }
 0x558   : > { %p1407_p13 = pneg %p1406_p6 }
 0x55a   : > { %p1412_p3 = pnand %p1411_p1, %p1407_p13 }
 0x55c   : > { %1415 = shalt.err (!%p1412_p3)
}
 0x55d   : > { %1146 = dma.vmem_to_hbm [thread:$0]  (%p1675_p2), %s893_s24, 128, %s1790_s27, %s878_s21  }
 0x55e PF: > { %s904_s5 = sand.u32 1, %s1462_s30   ;;  %p1865_p5 = scmp.ne.s32.totalorder %s1863_s29, 0 }
 0x55f   : > { %p1866_p0 = scmp.ge.s32.totalorder %s1482_s14, 2  ;;  %s905_s7 = scalar_lea.sflag [#allocation8], %s904_s5 }
 0x561   : > { %p1166_p8 = pnand %p1866_p0, %p1865_p5 }
 0x563   : > { %p1167_p7 = pneg %p1166_p8 }
 0x565   : > { %1457 = dma.done.wait (%p1167_p7), %s905_s7, 128  }
 0x566   : > { %1459 = vsyncadd (%p1167_p7), %s905_s7, 4294967168  ;;  %s27_s14 = sadd.s32 1, %s1482_s14   ;;  %s1867_s12 = sld [smem:[#allocation20_spill]] }
 0x567   : > { %p24_p9 = scmp.ge.s32.totalorder %s27_s14, 4   ;;  %s1868_s13 = sld [smem:[#allocation21_spill]] }
 0x568   : > { %s1869_s30 = smov %s1466_s10  ;;  %s1870_s10 = smov %s1470_s11 }
 0x569   : > { %s1871_s11 = smov %s1680_s22  ;;  %26 = sbr.rel (!%p24_p9) target bundleno = 13 (0xd), region = 153 }
 0x56e   :  { %910 = vsyncpa [#allocation7], 1 }
 0x56f   :  { %912 = vsyncpa [#allocation7 + $0x1], 1 }
 0x570   :  { %913 = vsyncpa [#allocation10], 1 }
 0x571   :  { %914 = vsyncpa [#allocation13], 1 }
 0x572   :  { %915 = vsyncpa [#allocation8], 1 }
 0x573   :  { %917 = vsyncpa [#allocation8 + $0x1], 1 }

</bundles_post_ra>
